<compile_context>
chip_gen: v5e
topology: v5e:2x2
jax: 0.10.0
libtpu: 0.0.40
codegen_flags: <defaults>
</compile_context>

<pallas_src>
import jax
import jax.numpy as jnp
from jax import lax
from jax.experimental import pallas as pl
from jax.experimental.pallas import tpu as pltpu

INPUT_DIM = 10
MODEL_DIM = 64
NUM_HEADS = 4
NUM_LAYERS = 2
OUTPUT_DIM = 5
OUT_PAD = 128          # lane-dense padded width for the final projection
FF_DIM = 2048          # nn.TransformerEncoderLayer default dim_feedforward
LN_EPS = 1e-5          # nn.TransformerEncoderLayer default layer_norm_eps
HEAD_DIM = MODEL_DIM // NUM_HEADS


def _const_spec(shape):
    """Full-array block re-used (same block index) for every grid step."""
    return pl.BlockSpec(shape, lambda i: (0, 0))


def _layernorm(y, g, b):
    mean = jnp.mean(y, axis=-1, keepdims=True)
    var = jnp.mean((y - mean) ** 2, axis=-1, keepdims=True)
    return (y - mean) * lax.rsqrt(var + LN_EPS) * g + b


# ---------------------------------------------------------------- kernels ----

def _embed_kernel(x_ref, w_ref, b_ref, pos_ref, o_ref):
    # x_ref: (S, INPUT_DIM) f32, w_ref: (INPUT_DIM, D) bf16, pos_ref: (S, D) f32
    y = jnp.dot(x_ref[...].astype(jnp.bfloat16), w_ref[...],
                preferred_element_type=jnp.float32)
    o_ref[...] = (y + b_ref[...] + pos_ref[...]).astype(o_ref.dtype)


def _encoder_layer_kernel(x_ref, qkv_w_ref, qkv_b_ref, out_w_ref, out_b_ref,
                          ln1_g_ref, ln1_b_ref, ff1_w_ref, ff1_b_ref,
                          ff2_w_ref, ff2_b_ref, ln2_g_ref, ln2_b_ref, o_ref):
    # One batch element per grid step.  x_ref: (S, D) f32.
    x = x_ref[...]                                   # (S, D) f32
    s_len = x.shape[0]
    xb = x.astype(jnp.bfloat16)

    # ---- self attention ----
    qkv = jnp.dot(xb, qkv_w_ref[...],
                  preferred_element_type=jnp.float32) + qkv_b_ref[...]  # (S, 3D)
    q = qkv[:, 0:MODEL_DIM]
    k = qkv[:, MODEL_DIM:2 * MODEL_DIM]
    v = qkv[:, 2 * MODEL_DIM:3 * MODEL_DIM]

    scale = 1.0 / (HEAD_DIM ** 0.5)
    # Fold the output projection into the head loop:
    #   concat_h(O_h) @ Wo == sum_h O_h @ Wo[h*hd:(h+1)*hd, :]
    # -> full-width f32 accumulator, no narrow lane stores, no concat.
    acc = jnp.zeros((s_len, MODEL_DIM), jnp.float32)
    for h in range(NUM_HEADS):
        lo = h * HEAD_DIM
        qh = q[:, lo:lo + HEAD_DIM].astype(jnp.bfloat16)
        kh = k[:, lo:lo + HEAD_DIM].astype(jnp.bfloat16)
        vh = v[:, lo:lo + HEAD_DIM].astype(jnp.bfloat16)
        # q @ k^T without materializing a transpose: contract last dims.
        sc = lax.dot_general(qh, kh, (((1,), (1,)), ((), ())),
                             preferred_element_type=jnp.float32) * scale
        sc = sc - jnp.max(sc, axis=-1, keepdims=True)
        p = jnp.exp(sc)
        p = p / jnp.sum(p, axis=-1, keepdims=True)
        oh = jnp.dot(p.astype(jnp.bfloat16), vh,
                     preferred_element_type=jnp.float32)          # (S, hd)
        wo_h = out_w_ref[pl.ds(lo, HEAD_DIM), :]                  # (hd, D) bf16
        acc = acc + jnp.dot(oh.astype(jnp.bfloat16), wo_h,
                            preferred_element_type=jnp.float32)
    attn = acc + out_b_ref[...]

    # ---- add & norm 1 (post-norm) ----
    h1 = _layernorm(x + attn, ln1_g_ref[...], ln1_b_ref[...])

    # ---- feed forward (the (S, FF_DIM) intermediate stays in VMEM) ----
    ff = jnp.dot(h1.astype(jnp.bfloat16), ff1_w_ref[...],
                 preferred_element_type=jnp.float32) + ff1_b_ref[...]
    ff = jnp.maximum(ff, 0.0)
    ff = jnp.dot(ff.astype(jnp.bfloat16), ff2_w_ref[...],
                 preferred_element_type=jnp.float32) + ff2_b_ref[...]

    # ---- add & norm 2 + single lane-dense store ----
    out = _layernorm(h1 + ff, ln2_g_ref[...], ln2_b_ref[...])
    o_ref[...] = out.astype(o_ref.dtype)


def _fc_kernel(x_ref, w_ref, b_ref, o_ref):
    # Output width is padded to OUT_PAD lanes so the store is unmasked.
    y = jnp.dot(x_ref[...].astype(jnp.bfloat16), w_ref[...],
                preferred_element_type=jnp.float32)
    o_ref[...] = (y + b_ref[...]).astype(o_ref.dtype)


# --------------------------------------------------------------- wrappers ----

def pallas_embed(x, emb_w, emb_b, pos_s):
    b, s, _ = x.shape
    return pl.pallas_call(
        _embed_kernel,
        grid=(b,),
        out_shape=jax.ShapeDtypeStruct((b, s, MODEL_DIM), jnp.float32),
        in_specs=[
            pl.BlockSpec((None, s, INPUT_DIM), lambda i: (i, 0, 0)),
            _const_spec(emb_w.shape),
            _const_spec(emb_b.shape),
            _const_spec(pos_s.shape),
        ],
        out_specs=pl.BlockSpec((None, s, MODEL_DIM), lambda i: (i, 0, 0)),
        compiler_params=pltpu.CompilerParams(dimension_semantics=("parallel",)),
    )(x, emb_w, emb_b, pos_s)


_LAYER_KEYS = ("qkv_w", "qkv_b", "out_w", "out_b", "ln1_g", "ln1_b",
               "ff1_w", "ff1_b", "ff2_w", "ff2_b", "ln2_g", "ln2_b")


def pallas_encoder_layer(x, layer):
    b, s, d = x.shape
    weights = [layer[k] for k in _LAYER_KEYS]
    x_spec = pl.BlockSpec((None, s, d), lambda i: (i, 0, 0))
    return pl.pallas_call(
        _encoder_layer_kernel,
        grid=(b,),
        out_shape=jax.ShapeDtypeStruct((b, s, d), jnp.float32),
        in_specs=[x_spec] + [_const_spec(w.shape) for w in weights],
        out_specs=x_spec,
        compiler_params=pltpu.CompilerParams(dimension_semantics=("parallel",)),
    )(x, *weights)


def pallas_fc(x, fc_w_pad, fc_b_pad):
    b, s, d = x.shape
    n = fc_w_pad.shape[1]
    out = pl.pallas_call(
        _fc_kernel,
        grid=(b,),
        out_shape=jax.ShapeDtypeStruct((b, s, n), jnp.float32),
        in_specs=[
            pl.BlockSpec((None, s, d), lambda i: (i, 0, 0)),
            _const_spec(fc_w_pad.shape),
            _const_spec(fc_b_pad.shape),
        ],
        out_specs=pl.BlockSpec((None, s, n), lambda i: (i, 0, 0)),
        compiler_params=pltpu.CompilerParams(dimension_semantics=("parallel",)),
    )(x, fc_w_pad, fc_b_pad)
    return out[:, :, :OUTPUT_DIM]     # drop zero-padded lanes in the wrapper


# ----------------------------------------------------------------- params ----

def init_params(key):
    def nrm(k, shape, scale=0.05, dtype=jnp.float32):
        return (scale * jax.random.normal(k, shape, dtype=jnp.float32)).astype(dtype)

    keys = iter(jax.random.split(key, 64))
    bf16 = jnp.bfloat16

    # final projection padded to a lane-dense width (real columns = OUTPUT_DIM)
    fc_w = nrm(next(keys), (MODEL_DIM, OUTPUT_DIM))
    fc_b = nrm(next(keys), (1, OUTPUT_DIM))
    fc_w_pad = jnp.zeros((MODEL_DIM, OUT_PAD), jnp.float32).at[:, :OUTPUT_DIM].set(fc_w)
    fc_b_pad = jnp.zeros((1, OUT_PAD), jnp.float32).at[:, :OUTPUT_DIM].set(fc_b)

    params = {
        "emb_w": nrm(next(keys), (INPUT_DIM, MODEL_DIM), dtype=bf16),
        "emb_b": nrm(next(keys), (1, MODEL_DIM)),
        # nn.Parameter(torch.zeros(1, 500, model_dim)) — learnable pos encoding;
        # initialized non-zero here so the add is exercised.
        "pos": nrm(next(keys), (1, 500, MODEL_DIM)),
        "fc_w": fc_w_pad.astype(bf16),
        "fc_b": fc_b_pad,
        "layers": [],
    }
    for _ in range(NUM_LAYERS):
        layer = {
            "qkv_w": nrm(next(keys), (MODEL_DIM, 3 * MODEL_DIM), dtype=bf16),
            "qkv_b": nrm(next(keys), (1, 3 * MODEL_DIM)),
            "out_w": nrm(next(keys), (MODEL_DIM, MODEL_DIM), dtype=bf16),
            "out_b": nrm(next(keys), (1, MODEL_DIM)),
            "ln1_g": jnp.ones((1, MODEL_DIM), jnp.float32),
            "ln1_b": jnp.zeros((1, MODEL_DIM), jnp.float32),
            "ff1_w": nrm(next(keys), (MODEL_DIM, FF_DIM), dtype=bf16),
            "ff1_b": nrm(next(keys), (1, FF_DIM)),
            "ff2_w": nrm(next(keys), (FF_DIM, MODEL_DIM), dtype=bf16),
            "ff2_b": nrm(next(keys), (1, MODEL_DIM)),
            "ln2_g": jnp.ones((1, MODEL_DIM), jnp.float32),
            "ln2_b": jnp.zeros((1, MODEL_DIM), jnp.float32),
        }
        params["layers"].append(layer)
    return params


# ---------------------------------------------------------------- forward ----

@jax.jit
def transformer_forward(params, x):
    b, s, _ = x.shape
    pos_s = params["pos"][0, :s, :]                       # (S, D), shared per batch
    h = pallas_embed(x, params["emb_w"], params["emb_b"], pos_s)
    for layer in params["layers"]:
        h = pallas_encoder_layer(h, layer)
    return pallas_fc(h, params["fc_w"], params["fc_b"])   # (B, S, OUTPUT_DIM)


if __name__ == "__main__":
    key = jax.random.PRNGKey(0)
    pkey, xkey = jax.random.split(key)
    params = init_params(pkey)

    batch, seq = 2, 8
    x = jax.random.normal(xkey, (batch, seq, INPUT_DIM), dtype=jnp.float32)

    out = transformer_forward(params, x)
    out = jax.block_until_ready(out)

    assert out.shape == (batch, seq, OUTPUT_DIM), out.shape
    assert jnp.all(jnp.isfinite(out))
    print("KERNEL_OK")
</pallas_src>

<mosaic_0001>
module attributes {stable_mosaic.version = 11 : i64} {
  func.func @_embed_kernel(%arg0: i32, %arg1: memref<1x8x10xf32, #tpu.memory_space<vmem>>, %arg2: memref<10x64xbf16, #tpu.memory_space<vmem>>, %arg3: memref<1x64xf32, #tpu.memory_space<vmem>>, %arg4: memref<8x64xf32, #tpu.memory_space<vmem>>, %arg5: memref<1x8x64xf32, #tpu.memory_space<vmem>>) attributes {dimension_semantics = [#tpu.dimension_semantics<parallel>], iteration_bounds = array<i64: 2>, scalar_prefetch = 0 : i64, scratch_operands = 0 : i64, tpu.core_type = #tpu.core_type<tc>, window_params = [{transform_indices = @transform_0, window_bounds = array<i64: 1, 8, 10>}, {pipeline_mode = #tpu.pipeline_mode<synchronous>, transform_indices = @transform_1, window_bounds = array<i64: 10, 64>}, {pipeline_mode = #tpu.pipeline_mode<synchronous>, transform_indices = @transform_2, window_bounds = array<i64: 1, 64>}, {pipeline_mode = #tpu.pipeline_mode<synchronous>, transform_indices = @transform_3, window_bounds = array<i64: 8, 64>}, {transform_indices = @transform_4, window_bounds = array<i64: 1, 8, 64>}]} {
    %c0 = arith.constant 0 : index
    %c0_0 = arith.constant 0 : index
    %c0_1 = arith.constant 0 : index
    %0 = vector.load %arg1[%c0, %c0_0, %c0_1] : memref<1x8x10xf32, #tpu.memory_space<vmem>>, vector<1x8x10xf32>
    %1 = vector.shape_cast %0 : vector<1x8x10xf32> to vector<8x10xf32>
    %2 = arith.truncf %1 : vector<8x10xf32> to vector<8x10xbf16>
    %c0_2 = arith.constant 0 : index
    %c0_3 = arith.constant 0 : index
    %3 = vector.load %arg2[%c0_2, %c0_3] : memref<10x64xbf16, #tpu.memory_space<vmem>>, vector<10x64xbf16>
    %cst = arith.constant dense<0.000000e+00> : vector<8x64xf32>
    %4 = tpu.matmul %2, %3, %cst {dimension_numbers = #tpu.dot_dimension_numbers<[1], [0], [0], [1], [0, 0, 1, 1], [], []>} : vector<8x10xbf16>, vector<10x64xbf16>, vector<8x64xf32> -> vector<8x64xf32>
    %c0_4 = arith.constant 0 : index
    %c0_5 = arith.constant 0 : index
    %5 = vector.load %arg3[%c0_4, %c0_5] : memref<1x64xf32, #tpu.memory_space<vmem>>, vector<1x64xf32>
    %6 = vector.broadcast %5 : vector<1x64xf32> to vector<8x64xf32>
    %7 = arith.addf %4, %6 : vector<8x64xf32>
    %c0_6 = arith.constant 0 : index
    %c0_7 = arith.constant 0 : index
    %8 = vector.load %arg4[%c0_6, %c0_7] : memref<8x64xf32, #tpu.memory_space<vmem>>, vector<8x64xf32>
    %9 = arith.addf %7, %8 : vector<8x64xf32>
    %c0_8 = arith.constant 0 : index
    %c0_9 = arith.constant 0 : index
    %c0_10 = arith.constant 0 : index
    %10 = vector.load %arg5[%c0_8, %c0_9, %c0_10] : memref<1x8x64xf32, #tpu.memory_space<vmem>>, vector<1x8x64xf32>
    %11 = vector.shape_cast %10 : vector<1x8x64xf32> to vector<8x64xf32>
    %12 = vector.shape_cast %9 : vector<8x64xf32> to vector<1x8x64xf32>
    tpu.vector_store %arg5[%c0_8, %c0_9, %c0_10], %12 {strides = array<i32>} : memref<1x8x64xf32, #tpu.memory_space<vmem>>, vector<1x8x64xf32>,
    return
  }
  func.func @transform_0(%arg0: i32) -> (i32, i32, i32) {
    %c0_i32 = arith.constant 0 : i32
    %c0_i32_0 = arith.constant 0 : i32
    %c0_i32_1 = arith.constant 0 : i32
    return %arg0, %c0_i32, %c0_i32_0 : i32, i32, i32
  }
  func.func @transform_1(%arg0: i32) -> (i32, i32) {
    %c0_i32 = arith.constant 0 : i32
    %c0_i32_0 = arith.constant 0 : i32
    %c0_i32_1 = arith.constant 0 : i32
    return %c0_i32, %c0_i32_0 : i32, i32
  }
  func.func @transform_2(%arg0: i32) -> (i32, i32) {
    %c0_i32 = arith.constant 0 : i32
    %c0_i32_0 = arith.constant 0 : i32
    %c0_i32_1 = arith.constant 0 : i32
    return %c0_i32, %c0_i32_0 : i32, i32
  }
  func.func @transform_3(%arg0: i32) -> (i32, i32) {
    %c0_i32 = arith.constant 0 : i32
    %c0_i32_0 = arith.constant 0 : i32
    %c0_i32_1 = arith.constant 0 : i32
    return %c0_i32, %c0_i32_0 : i32, i32
  }
  func.func @transform_4(%arg0: i32) -> (i32, i32, i32) {
    %c0_i32 = arith.constant 0 : i32
    %c0_i32_0 = arith.constant 0 : i32
    %c0_i32_1 = arith.constant 0 : i32
    return %arg0, %c0_i32, %c0_i32_0 : i32, i32, i32
  }
}

module attributes {stable_mosaic.version = 11 : i64} {
  func.func @_encoder_layer_kernel(%arg0: i32, %arg1: memref<1x8x64xf32, #tpu.memory_space<vmem>>, %arg2: memref<64x192xbf16, #tpu.memory_space<vmem>>, %arg3: memref<1x192xf32, #tpu.memory_space<vmem>>, %arg4: memref<64x64xbf16, #tpu.memory_space<vmem>>, %arg5: memref<1x64xf32, #tpu.memory_space<vmem>>, %arg6: memref<1x64xf32, #tpu.memory_space<vmem>>, %arg7: memref<1x64xf32, #tpu.memory_space<vmem>>, %arg8: memref<64x2048xbf16, #tpu.memory_space<vmem>>, %arg9: memref<1x2048xf32, #tpu.memory_space<vmem>>, %arg10: memref<2048x64xbf16, #tpu.memory_space<vmem>>, %arg11: memref<1x64xf32, #tpu.memory_space<vmem>>, %arg12: memref<1x64xf32, #tpu.memory_space<vmem>>, %arg13: memref<1x64xf32, #tpu.memory_space<vmem>>, %arg14: memref<1x8x64xf32, #tpu.memory_space<vmem>>) attributes {dimension_semantics = [#tpu.dimension_semantics<parallel>], iteration_bounds = array<i64: 2>, scalar_prefetch = 0 : i64, scratch_operands = 0 : i64, tpu.core_type = #tpu.core_type<tc>, window_params = [{transform_indices = @transform_0, window_bounds = array<i64: 1, 8, 64>}, {pipeline_mode = #tpu.pipeline_mode<synchronous>, transform_indices = @transform_1, window_bounds = array<i64: 64, 192>}, {pipeline_mode = #tpu.pipeline_mode<synchronous>, transform_indices = @transform_2, window_bounds = array<i64: 1, 192>}, {pipeline_mode = #tpu.pipeline_mode<synchronous>, transform_indices = @transform_3, window_bounds = array<i64: 64, 64>}, {pipeline_mode = #tpu.pipeline_mode<synchronous>, transform_indices = @transform_4, window_bounds = array<i64: 1, 64>}, {pipeline_mode = #tpu.pipeline_mode<synchronous>, transform_indices = @transform_5, window_bounds = array<i64: 1, 64>}, {pipeline_mode = #tpu.pipeline_mode<synchronous>, transform_indices = @transform_6, window_bounds = array<i64: 1, 64>}, {pipeline_mode = #tpu.pipeline_mode<synchronous>, transform_indices = @transform_7, window_bounds = array<i64: 64, 2048>}, {pipeline_mode = #tpu.pipeline_mode<synchronous>, transform_indices = @transform_8, window_bounds = array<i64: 1, 2048>}, {pipeline_mode = #tpu.pipeline_mode<synchronous>, transform_indices = @transform_9, window_bounds = array<i64: 2048, 64>}, {pipeline_mode = #tpu.pipeline_mode<synchronous>, transform_indices = @transform_10, window_bounds = array<i64: 1, 64>}, {pipeline_mode = #tpu.pipeline_mode<synchronous>, transform_indices = @transform_11, window_bounds = array<i64: 1, 64>}, {pipeline_mode = #tpu.pipeline_mode<synchronous>, transform_indices = @transform_12, window_bounds = array<i64: 1, 64>}, {transform_indices = @transform_13, window_bounds = array<i64: 1, 8, 64>}]} {
    %c0 = arith.constant 0 : index
    %c0_0 = arith.constant 0 : index
    %c0_1 = arith.constant 0 : index
    %0 = vector.load %arg1[%c0, %c0_0, %c0_1] : memref<1x8x64xf32, #tpu.memory_space<vmem>>, vector<1x8x64xf32>
    %1 = vector.shape_cast %0 : vector<1x8x64xf32> to vector<8x64xf32>
    %2 = arith.truncf %1 : vector<8x64xf32> to vector<8x64xbf16>
    %c0_2 = arith.constant 0 : index
    %c0_3 = arith.constant 0 : index
    %3 = vector.load %arg2[%c0_2, %c0_3] : memref<64x192xbf16, #tpu.memory_space<vmem>>, vector<64x192xbf16>
    %cst = arith.constant dense<0.000000e+00> : vector<8x192xf32>
    %4 = tpu.matmul %2, %3, %cst {dimension_numbers = #tpu.dot_dimension_numbers<[1], [0], [0], [1], [0, 0, 1, 1], [], []>} : vector<8x64xbf16>, vector<64x192xbf16>, vector<8x192xf32> -> vector<8x192xf32>
    %c0_4 = arith.constant 0 : index
    %c0_5 = arith.constant 0 : index
    %5 = vector.load %arg3[%c0_4, %c0_5] : memref<1x192xf32, #tpu.memory_space<vmem>>, vector<1x192xf32>
    %6 = vector.broadcast %5 : vector<1x192xf32> to vector<8x192xf32>
    %7 = arith.addf %4, %6 : vector<8x192xf32>
    %8 = vector.extract_strided_slice %7 {offsets = [0, 0], sizes = [8, 64], strides = [1, 1]} : vector<8x192xf32> to vector<8x64xf32>
    %9 = vector.extract_strided_slice %7 {offsets = [0, 64], sizes = [8, 64], strides = [1, 1]} : vector<8x192xf32> to vector<8x64xf32>
    %10 = vector.extract_strided_slice %7 {offsets = [0, 128], sizes = [8, 64], strides = [1, 1]} : vector<8x192xf32> to vector<8x64xf32>
    %cst_6 = arith.constant 0.000000e+00 : f32
    %11 = vector.broadcast %cst_6 : f32 to vector<8x64xf32>
    %12 = vector.extract_strided_slice %8 {offsets = [0, 0], sizes = [8, 16], strides = [1, 1]} : vector<8x64xf32> to vector<8x16xf32>
    %13 = arith.truncf %12 : vector<8x16xf32> to vector<8x16xbf16>
    %14 = vector.extract_strided_slice %9 {offsets = [0, 0], sizes = [8, 16], strides = [1, 1]} : vector<8x64xf32> to vector<8x16xf32>
    %15 = arith.truncf %14 : vector<8x16xf32> to vector<8x16xbf16>
    %16 = vector.extract_strided_slice %10 {offsets = [0, 0], sizes = [8, 16], strides = [1, 1]} : vector<8x64xf32> to vector<8x16xf32>
    %17 = arith.truncf %16 : vector<8x16xf32> to vector<8x16xbf16>
    %cst_7 = arith.constant dense<0.000000e+00> : vector<8x8xf32>
    %18 = tpu.matmul %13, %15, %cst_7 {dimension_numbers = #tpu.dot_dimension_numbers<[1], [1], [0], [0], [0, 0, 1, 0], [], []>} : vector<8x16xbf16>, vector<8x16xbf16>, vector<8x8xf32> -> vector<8x8xf32>
    %cst_8 = arith.constant 2.500000e-01 : f32
    %19 = vector.broadcast %cst_8 : f32 to vector<8x8xf32>
    %20 = arith.mulf %18, %19 : vector<8x8xf32>
    %cst_9 = arith.constant dense<0xFF800000> : vector<8xf32>
    %21 = vector.multi_reduction <maximumf>, %20, %cst_9 [1] : vector<8x8xf32> to vector<8xf32>
    %22 = vector.shape_cast %21 : vector<8xf32> to vector<8x1xf32>
    %23 = vector.broadcast %22 : vector<8x1xf32> to vector<8x8xf32>
    %24 = arith.subf %20, %23 : vector<8x8xf32>
    %25 = math.exp %24 : vector<8x8xf32>
    %cst_10 = arith.constant dense<0.000000e+00> : vector<8xf32>
    %26 = vector.multi_reduction <add>, %25, %cst_10 [1] : vector<8x8xf32> to vector<8xf32>
    %27 = vector.shape_cast %26 : vector<8xf32> to vector<8x1xf32>
    %28 = vector.broadcast %27 : vector<8x1xf32> to vector<8x8xf32>
    %29 = arith.divf %25, %28 : vector<8x8xf32>
    %30 = arith.truncf %29 : vector<8x8xf32> to vector<8x8xbf16>
    %cst_11 = arith.constant dense<0.000000e+00> : vector<8x16xf32>
    %31 = tpu.matmul %30, %17, %cst_11 {dimension_numbers = #tpu.dot_dimension_numbers<[1], [0], [0], [1], [0, 0, 1, 1], [], []>} : vector<8x8xbf16>, vector<8x16xbf16>, vector<8x16xf32> -> vector<8x16xf32>
    %c0_12 = arith.constant 0 : index
    %c0_13 = arith.constant 0 : index
    %32 = vector.load %arg4[%c0_12, %c0_13] : memref<64x64xbf16, #tpu.memory_space<vmem>>, vector<16x64xbf16>
    %33 = arith.truncf %31 : vector<8x16xf32> to vector<8x16xbf16>
    %cst_14 = arith.constant dense<0.000000e+00> : vector<8x64xf32>
    %34 = tpu.matmul %33, %32, %cst_14 {dimension_numbers = #tpu.dot_dimension_numbers<[1], [0], [0], [1], [0, 0, 1, 1], [], []>} : vector<8x16xbf16>, vector<16x64xbf16>, vector<8x64xf32> -> vector<8x64xf32>
    %35 = arith.addf %11, %34 : vector<8x64xf32>
    %36 = vector.extract_strided_slice %8 {offsets = [0, 16], sizes = [8, 16], strides = [1, 1]} : vector<8x64xf32> to vector<8x16xf32>
    %37 = arith.truncf %36 : vector<8x16xf32> to vector<8x16xbf16>
    %38 = vector.extract_strided_slice %9 {offsets = [0, 16], sizes = [8, 16], strides = [1, 1]} : vector<8x64xf32> to vector<8x16xf32>
    %39 = arith.truncf %38 : vector<8x16xf32> to vector<8x16xbf16>
    %40 = vector.extract_strided_slice %10 {offsets = [0, 16], sizes = [8, 16], strides = [1, 1]} : vector<8x64xf32> to vector<8x16xf32>
    %41 = arith.truncf %40 : vector<8x16xf32> to vector<8x16xbf16>
    %cst_15 = arith.constant dense<0.000000e+00> : vector<8x8xf32>
    %42 = tpu.matmul %37, %39, %cst_15 {dimension_numbers = #tpu.dot_dimension_numbers<[1], [1], [0], [0], [0, 0, 1, 0], [], []>} : vector<8x16xbf16>, vector<8x16xbf16>, vector<8x8xf32> -> vector<8x8xf32>
    %cst_16 = arith.constant 2.500000e-01 : f32
    %43 = vector.broadcast %cst_16 : f32 to vector<8x8xf32>
    %44 = arith.mulf %42, %43 : vector<8x8xf32>
    %cst_17 = arith.constant dense<0xFF800000> : vector<8xf32>
    %45 = vector.multi_reduction <maximumf>, %44, %cst_17 [1] : vector<8x8xf32> to vector<8xf32>
    %46 = vector.shape_cast %45 : vector<8xf32> to vector<8x1xf32>
    %47 = vector.broadcast %46 : vector<8x1xf32> to vector<8x8xf32>
    %48 = arith.subf %44, %47 : vector<8x8xf32>
    %49 = math.exp %48 : vector<8x8xf32>
    %cst_18 = arith.constant dense<0.000000e+00> : vector<8xf32>
    %50 = vector.multi_reduction <add>, %49, %cst_18 [1] : vector<8x8xf32> to vector<8xf32>
    %51 = vector.shape_cast %50 : vector<8xf32> to vector<8x1xf32>
    %52 = vector.broadcast %51 : vector<8x1xf32> to vector<8x8xf32>
    %53 = arith.divf %49, %52 : vector<8x8xf32>
    %54 = arith.truncf %53 : vector<8x8xf32> to vector<8x8xbf16>
    %cst_19 = arith.constant dense<0.000000e+00> : vector<8x16xf32>
    %55 = tpu.matmul %54, %41, %cst_19 {dimension_numbers = #tpu.dot_dimension_numbers<[1], [0], [0], [1], [0, 0, 1, 1], [], []>} : vector<8x8xbf16>, vector<8x16xbf16>, vector<8x16xf32> -> vector<8x16xf32>
    %c16 = arith.constant 16 : index
    %c0_20 = arith.constant 0 : index
    %56 = vector.load %arg4[%c16, %c0_20] : memref<64x64xbf16, #tpu.memory_space<vmem>>, vector<16x64xbf16>
    %57 = arith.truncf %55 : vector<8x16xf32> to vector<8x16xbf16>
    %cst_21 = arith.constant dense<0.000000e+00> : vector<8x64xf32>
    %58 = tpu.matmul %57, %56, %cst_21 {dimension_numbers = #tpu.dot_dimension_numbers<[1], [0], [0], [1], [0, 0, 1, 1], [], []>} : vector<8x16xbf16>, vector<16x64xbf16>, vector<8x64xf32> -> vector<8x64xf32>
    %59 = arith.addf %35, %58 : vector<8x64xf32>
    %60 = vector.extract_strided_slice %8 {offsets = [0, 32], sizes = [8, 16], strides = [1, 1]} : vector<8x64xf32> to vector<8x16xf32>
    %61 = arith.truncf %60 : vector<8x16xf32> to vector<8x16xbf16>
    %62 = vector.extract_strided_slice %9 {offsets = [0, 32], sizes = [8, 16], strides = [1, 1]} : vector<8x64xf32> to vector<8x16xf32>
    %63 = arith.truncf %62 : vector<8x16xf32> to vector<8x16xbf16>
    %64 = vector.extract_strided_slice %10 {offsets = [0, 32], sizes = [8, 16], strides = [1, 1]} : vector<8x64xf32> to vector<8x16xf32>
    %65 = arith.truncf %64 : vector<8x16xf32> to vector<8x16xbf16>
    %cst_22 = arith.constant dense<0.000000e+00> : vector<8x8xf32>
    %66 = tpu.matmul %61, %63, %cst_22 {dimension_numbers = #tpu.dot_dimension_numbers<[1], [1], [0], [0], [0, 0, 1, 0], [], []>} : vector<8x16xbf16>, vector<8x16xbf16>, vector<8x8xf32> -> vector<8x8xf32>
    %cst_23 = arith.constant 2.500000e-01 : f32
    %67 = vector.broadcast %cst_23 : f32 to vector<8x8xf32>
    %68 = arith.mulf %66, %67 : vector<8x8xf32>
    %cst_24 = arith.constant dense<0xFF800000> : vector<8xf32>
    %69 = vector.multi_reduction <maximumf>, %68, %cst_24 [1] : vector<8x8xf32> to vector<8xf32>
    %70 = vector.shape_cast %69 : vector<8xf32> to vector<8x1xf32>
    %71 = vector.broadcast %70 : vector<8x1xf32> to vector<8x8xf32>
    %72 = arith.subf %68, %71 : vector<8x8xf32>
    %73 = math.exp %72 : vector<8x8xf32>
    %cst_25 = arith.constant dense<0.000000e+00> : vector<8xf32>
    %74 = vector.multi_reduction <add>, %73, %cst_25 [1] : vector<8x8xf32> to vector<8xf32>
    %75 = vector.shape_cast %74 : vector<8xf32> to vector<8x1xf32>
    %76 = vector.broadcast %75 : vector<8x1xf32> to vector<8x8xf32>
    %77 = arith.divf %73, %76 : vector<8x8xf32>
    %78 = arith.truncf %77 : vector<8x8xf32> to vector<8x8xbf16>
    %cst_26 = arith.constant dense<0.000000e+00> : vector<8x16xf32>
    %79 = tpu.matmul %78, %65, %cst_26 {dimension_numbers = #tpu.dot_dimension_numbers<[1], [0], [0], [1], [0, 0, 1, 1], [], []>} : vector<8x8xbf16>, vector<8x16xbf16>, vector<8x16xf32> -> vector<8x16xf32>
    %c32 = arith.constant 32 : index
    %c0_27 = arith.constant 0 : index
    %80 = vector.load %arg4[%c32, %c0_27] : memref<64x64xbf16, #tpu.memory_space<vmem>>, vector<16x64xbf16>
    %81 = arith.truncf %79 : vector<8x16xf32> to vector<8x16xbf16>
    %cst_28 = arith.constant dense<0.000000e+00> : vector<8x64xf32>
    %82 = tpu.matmul %81, %80, %cst_28 {dimension_numbers = #tpu.dot_dimension_numbers<[1], [0], [0], [1], [0, 0, 1, 1], [], []>} : vector<8x16xbf16>, vector<16x64xbf16>, vector<8x64xf32> -> vector<8x64xf32>
    %83 = arith.addf %59, %82 : vector<8x64xf32>
    %84 = vector.extract_strided_slice %8 {offsets = [0, 48], sizes = [8, 16], strides = [1, 1]} : vector<8x64xf32> to vector<8x16xf32>
    %85 = arith.truncf %84 : vector<8x16xf32> to vector<8x16xbf16>
    %86 = vector.extract_strided_slice %9 {offsets = [0, 48], sizes = [8, 16], strides = [1, 1]} : vector<8x64xf32> to vector<8x16xf32>
    %87 = arith.truncf %86 : vector<8x16xf32> to vector<8x16xbf16>
    %88 = vector.extract_strided_slice %10 {offsets = [0, 48], sizes = [8, 16], strides = [1, 1]} : vector<8x64xf32> to vector<8x16xf32>
    %89 = arith.truncf %88 : vector<8x16xf32> to vector<8x16xbf16>
    %cst_29 = arith.constant dense<0.000000e+00> : vector<8x8xf32>
    %90 = tpu.matmul %85, %87, %cst_29 {dimension_numbers = #tpu.dot_dimension_numbers<[1], [1], [0], [0], [0, 0, 1, 0], [], []>} : vector<8x16xbf16>, vector<8x16xbf16>, vector<8x8xf32> -> vector<8x8xf32>
    %cst_30 = arith.constant 2.500000e-01 : f32
    %91 = vector.broadcast %cst_30 : f32 to vector<8x8xf32>
    %92 = arith.mulf %90, %91 : vector<8x8xf32>
    %cst_31 = arith.constant dense<0xFF800000> : vector<8xf32>
    %93 = vector.multi_reduction <maximumf>, %92, %cst_31 [1] : vector<8x8xf32> to vector<8xf32>
    %94 = vector.shape_cast %93 : vector<8xf32> to vector<8x1xf32>
    %95 = vector.broadcast %94 : vector<8x1xf32> to vector<8x8xf32>
    %96 = arith.subf %92, %95 : vector<8x8xf32>
    %97 = math.exp %96 : vector<8x8xf32>
    %cst_32 = arith.constant dense<0.000000e+00> : vector<8xf32>
    %98 = vector.multi_reduction <add>, %97, %cst_32 [1] : vector<8x8xf32> to vector<8xf32>
    %99 = vector.shape_cast %98 : vector<8xf32> to vector<8x1xf32>
    %100 = vector.broadcast %99 : vector<8x1xf32> to vector<8x8xf32>
    %101 = arith.divf %97, %100 : vector<8x8xf32>
    %102 = arith.truncf %101 : vector<8x8xf32> to vector<8x8xbf16>
    %cst_33 = arith.constant dense<0.000000e+00> : vector<8x16xf32>
    %103 = tpu.matmul %102, %89, %cst_33 {dimension_numbers = #tpu.dot_dimension_numbers<[1], [0], [0], [1], [0, 0, 1, 1], [], []>} : vector<8x8xbf16>, vector<8x16xbf16>, vector<8x16xf32> -> vector<8x16xf32>
    %c48 = arith.constant 48 : index
    %c0_34 = arith.constant 0 : index
    %104 = vector.load %arg4[%c48, %c0_34] : memref<64x64xbf16, #tpu.memory_space<vmem>>, vector<16x64xbf16>
    %105 = arith.truncf %103 : vector<8x16xf32> to vector<8x16xbf16>
    %cst_35 = arith.constant dense<0.000000e+00> : vector<8x64xf32>
    %106 = tpu.matmul %105, %104, %cst_35 {dimension_numbers = #tpu.dot_dimension_numbers<[1], [0], [0], [1], [0, 0, 1, 1], [], []>} : vector<8x16xbf16>, vector<16x64xbf16>, vector<8x64xf32> -> vector<8x64xf32>
    %107 = arith.addf %83, %106 : vector<8x64xf32>
    %c0_36 = arith.constant 0 : index
    %c0_37 = arith.constant 0 : index
    %108 = vector.load %arg5[%c0_36, %c0_37] : memref<1x64xf32, #tpu.memory_space<vmem>>, vector<1x64xf32>
    %109 = vector.broadcast %108 : vector<1x64xf32> to vector<8x64xf32>
    %110 = arith.addf %107, %109 : vector<8x64xf32>
    %111 = arith.addf %1, %110 : vector<8x64xf32>
    %c0_38 = arith.constant 0 : index
    %c0_39 = arith.constant 0 : index
    %112 = vector.load %arg6[%c0_38, %c0_39] : memref<1x64xf32, #tpu.memory_space<vmem>>, vector<1x64xf32>
    %c0_40 = arith.constant 0 : index
    %c0_41 = arith.constant 0 : index
    %113 = vector.load %arg7[%c0_40, %c0_41] : memref<1x64xf32, #tpu.memory_space<vmem>>, vector<1x64xf32>
    %cst_42 = arith.constant dense<0.000000e+00> : vector<8xf32>
    %114 = vector.multi_reduction <add>, %111, %cst_42 [1] : vector<8x64xf32> to vector<8xf32>
    %115 = vector.shape_cast %114 : vector<8xf32> to vector<8x1xf32>
    %cst_43 = arith.constant 6.400000e+01 : f32
    %116 = vector.broadcast %cst_43 : f32 to vector<8x1xf32>
    %117 = arith.divf %115, %116 : vector<8x1xf32>
    %118 = vector.broadcast %117 : vector<8x1xf32> to vector<8x64xf32>
    %119 = arith.subf %111, %118 : vector<8x64xf32>
    %120 = arith.mulf %119, %119 : vector<8x64xf32>
    %cst_44 = arith.constant dense<0.000000e+00> : vector<8xf32>
    %121 = vector.multi_reduction <add>, %120, %cst_44 [1] : vector<8x64xf32> to vector<8xf32>
    %122 = vector.shape_cast %121 : vector<8xf32> to vector<8x1xf32>
    %cst_45 = arith.constant 6.400000e+01 : f32
    %123 = vector.broadcast %cst_45 : f32 to vector<8x1xf32>
    %124 = arith.divf %122, %123 : vector<8x1xf32>
    %125 = vector.broadcast %117 : vector<8x1xf32> to vector<8x64xf32>
    %126 = arith.subf %111, %125 : vector<8x64xf32>
    %cst_46 = arith.constant 9.99999974E-6 : f32
    %127 = vector.broadcast %cst_46 : f32 to vector<8x1xf32>
    %128 = arith.addf %124, %127 : vector<8x1xf32>
    %129 = math.rsqrt %128 : vector<8x1xf32>
    %130 = vector.broadcast %129 : vector<8x1xf32> to vector<8x64xf32>
    %131 = arith.mulf %126, %130 : vector<8x64xf32>
    %132 = vector.broadcast %112 : vector<1x64xf32> to vector<8x64xf32>
    %133 = arith.mulf %131, %132 : vector<8x64xf32>
    %134 = vector.broadcast %113 : vector<1x64xf32> to vector<8x64xf32>
    %135 = arith.addf %133, %134 : vector<8x64xf32>
    %136 = arith.truncf %135 : vector<8x64xf32> to vector<8x64xbf16>
    %c0_47 = arith.constant 0 : index
    %c0_48 = arith.constant 0 : index
    %137 = vector.load %arg8[%c0_47, %c0_48] : memref<64x2048xbf16, #tpu.memory_space<vmem>>, vector<64x2048xbf16>
    %cst_49 = arith.constant dense<0.000000e+00> : vector<8x2048xf32>
    %138 = tpu.matmul %136, %137, %cst_49 {dimension_numbers = #tpu.dot_dimension_numbers<[1], [0], [0], [1], [0, 0, 1, 1], [], []>} : vector<8x64xbf16>, vector<64x2048xbf16>, vector<8x2048xf32> -> vector<8x2048xf32>
    %c0_50 = arith.constant 0 : index
    %c0_51 = arith.constant 0 : index
    %139 = vector.load %arg9[%c0_50, %c0_51] : memref<1x2048xf32, #tpu.memory_space<vmem>>, vector<1x2048xf32>
    %140 = vector.broadcast %139 : vector<1x2048xf32> to vector<8x2048xf32>
    %141 = arith.addf %138, %140 : vector<8x2048xf32>
    %cst_52 = arith.constant 0.000000e+00 : f32
    %142 = vector.broadcast %cst_52 : f32 to vector<8x2048xf32>
    %143 = arith.maximumf %141, %142 : vector<8x2048xf32>
    %144 = arith.truncf %143 : vector<8x2048xf32> to vector<8x2048xbf16>
    %c0_53 = arith.constant 0 : index
    %c0_54 = arith.constant 0 : index
    %145 = vector.load %arg10[%c0_53, %c0_54] : memref<2048x64xbf16, #tpu.memory_space<vmem>>, vector<2048x64xbf16>
    %cst_55 = arith.constant dense<0.000000e+00> : vector<8x64xf32>
    %146 = tpu.matmul %144, %145, %cst_55 {dimension_numbers = #tpu.dot_dimension_numbers<[1], [0], [0], [1], [0, 0, 1, 1], [], []>} : vector<8x2048xbf16>, vector<2048x64xbf16>, vector<8x64xf32> -> vector<8x64xf32>
    %c0_56 = arith.constant 0 : index
    %c0_57 = arith.constant 0 : index
    %147 = vector.load %arg11[%c0_56, %c0_57] : memref<1x64xf32, #tpu.memory_space<vmem>>, vector<1x64xf32>
    %148 = vector.broadcast %147 : vector<1x64xf32> to vector<8x64xf32>
    %149 = arith.addf %146, %148 : vector<8x64xf32>
    %150 = arith.addf %135, %149 : vector<8x64xf32>
    %c0_58 = arith.constant 0 : index
    %c0_59 = arith.constant 0 : index
    %151 = vector.load %arg12[%c0_58, %c0_59] : memref<1x64xf32, #tpu.memory_space<vmem>>, vector<1x64xf32>
    %c0_60 = arith.constant 0 : index
    %c0_61 = arith.constant 0 : index
    %152 = vector.load %arg13[%c0_60, %c0_61] : memref<1x64xf32, #tpu.memory_space<vmem>>, vector<1x64xf32>
    %cst_62 = arith.constant dense<0.000000e+00> : vector<8xf32>
    %153 = vector.multi_reduction <add>, %150, %cst_62 [1] : vector<8x64xf32> to vector<8xf32>
    %154 = vector.shape_cast %153 : vector<8xf32> to vector<8x1xf32>
    %cst_63 = arith.constant 6.400000e+01 : f32
    %155 = vector.broadcast %cst_63 : f32 to vector<8x1xf32>
    %156 = arith.divf %154, %155 : vector<8x1xf32>
    %157 = vector.broadcast %156 : vector<8x1xf32> to vector<8x64xf32>
    %158 = arith.subf %150, %157 : vector<8x64xf32>
    %159 = arith.mulf %158, %158 : vector<8x64xf32>
    %cst_64 = arith.constant dense<0.000000e+00> : vector<8xf32>
    %160 = vector.multi_reduction <add>, %159, %cst_64 [1] : vector<8x64xf32> to vector<8xf32>
    %161 = vector.shape_cast %160 : vector<8xf32> to vector<8x1xf32>
    %cst_65 = arith.constant 6.400000e+01 : f32
    %162 = vector.broadcast %cst_65 : f32 to vector<8x1xf32>
    %163 = arith.divf %161, %162 : vector<8x1xf32>
    %164 = vector.broadcast %156 : vector<8x1xf32> to vector<8x64xf32>
    %165 = arith.subf %150, %164 : vector<8x64xf32>
    %cst_66 = arith.constant 9.99999974E-6 : f32
    %166 = vector.broadcast %cst_66 : f32 to vector<8x1xf32>
    %167 = arith.addf %163, %166 : vector<8x1xf32>
    %168 = math.rsqrt %167 : vector<8x1xf32>
    %169 = vector.broadcast %168 : vector<8x1xf32> to vector<8x64xf32>
    %170 = arith.mulf %165, %169 : vector<8x64xf32>
    %171 = vector.broadcast %151 : vector<1x64xf32> to vector<8x64xf32>
    %172 = arith.mulf %170, %171 : vector<8x64xf32>
    %173 = vector.broadcast %152 : vector<1x64xf32> to vector<8x64xf32>
    %174 = arith.addf %172, %173 : vector<8x64xf32>
    %c0_67 = arith.constant 0 : index
    %c0_68 = arith.constant 0 : index
    %c0_69 = arith.constant 0 : index
    %175 = vector.load %arg14[%c0_67, %c0_68, %c0_69] : memref<1x8x64xf32, #tpu.memory_space<vmem>>, vector<1x8x64xf32>
    %176 = vector.shape_cast %175 : vector<1x8x64xf32> to vector<8x64xf32>
    %177 = vector.shape_cast %174 : vector<8x64xf32> to vector<1x8x64xf32>
    tpu.vector_store %arg14[%c0_67, %c0_68, %c0_69], %177 {strides = array<i32>} : memref<1x8x64xf32, #tpu.memory_space<vmem>>, vector<1x8x64xf32>,
    return
  }
  func.func @transform_0(%arg0: i32) -> (i32, i32, i32) {
    %c0_i32 = arith.constant 0 : i32
    %c0_i32_0 = arith.constant 0 : i32
    %c0_i32_1 = arith.constant 0 : i32
    return %arg0, %c0_i32, %c0_i32_0 : i32, i32, i32
  }
  func.func @transform_1(%arg0: i32) -> (i32, i32) {
    %c0_i32 = arith.constant 0 : i32
    %c0_i32_0 = arith.constant 0 : i32
    %c0_i32_1 = arith.constant 0 : i32
    return %c0_i32, %c0_i32_0 : i32, i32
  }
  func.func @transform_2(%arg0: i32) -> (i32, i32) {
    %c0_i32 = arith.constant 0 : i32
    %c0_i32_0 = arith.constant 0 : i32
    %c0_i32_1 = arith.constant 0 : i32
    return %c0_i32, %c0_i32_0 : i32, i32
  }
  func.func @transform_3(%arg0: i32) -> (i32, i32) {
    %c0_i32 = arith.constant 0 : i32
    %c0_i32_0 = arith.constant 0 : i32
    %c0_i32_1 = arith.constant 0 : i32
    return %c0_i32, %c0_i32_0 : i32, i32
  }
  func.func @transform_4(%arg0: i32) -> (i32, i32) {
    %c0_i32 = arith.constant 0 : i32
    %c0_i32_0 = arith.constant 0 : i32
    %c0_i32_1 = arith.constant 0 : i32
    return %c0_i32, %c0_i32_0 : i32, i32
  }
  func.func @transform_5(%arg0: i32) -> (i32, i32) {
    %c0_i32 = arith.constant 0 : i32
    %c0_i32_0 = arith.constant 0 : i32
    %c0_i32_1 = arith.constant 0 : i32
    return %c0_i32, %c0_i32_0 : i32, i32
  }
  func.func @transform_6(%arg0: i32) -> (i32, i32) {
    %c0_i32 = arith.constant 0 : i32
    %c0_i32_0 = arith.constant 0 : i32
    %c0_i32_1 = arith.constant 0 : i32
    return %c0_i32, %c0_i32_0 : i32, i32
  }
  func.func @transform_7(%arg0: i32) -> (i32, i32) {
    %c0_i32 = arith.constant 0 : i32
    %c0_i32_0 = arith.constant 0 : i32
    %c0_i32_1 = arith.constant 0 : i32
    return %c0_i32, %c0_i32_0 : i32, i32
  }
  func.func @transform_8(%arg0: i32) -> (i32, i32) {
    %c0_i32 = arith.constant 0 : i32
    %c0_i32_0 = arith.constant 0 : i32
    %c0_i32_1 = arith.constant 0 : i32
    return %c0_i32, %c0_i32_0 : i32, i32
  }
  func.func @transform_9(%arg0: i32) -> (i32, i32) {
    %c0_i32 = arith.constant 0 : i32
    %c0_i32_0 = arith.constant 0 : i32
    %c0_i32_1 = arith.constant 0 : i32
    return %c0_i32, %c0_i32_0 : i32, i32
  }
  func.func @transform_10(%arg0: i32) -> (i32, i32) {
    %c0_i32 = arith.constant 0 : i32
    %c0_i32_0 = arith.constant 0 : i32
    %c0_i32_1 = arith.constant 0 : i32
    return %c0_i32, %c0_i32_0 : i32, i32
  }
  func.func @transform_11(%arg0: i32) -> (i32, i32) {
    %c0_i32 = arith.constant 0 : i32
    %c0_i32_0 = arith.constant 0 : i32
    %c0_i32_1 = arith.constant 0 : i32
    return %c0_i32, %c0_i32_0 : i32, i32
  }
  func.func @transform_12(%arg0: i32) -> (i32, i32) {
    %c0_i32 = arith.constant 0 : i32
    %c0_i32_0 = arith.constant 0 : i32
    %c0_i32_1 = arith.constant 0 : i32
    return %c0_i32, %c0_i32_0 : i32, i32
  }
  func.func @transform_13(%arg0: i32) -> (i32, i32, i32) {
    %c0_i32 = arith.constant 0 : i32
    %c0_i32_0 = arith.constant 0 : i32
    %c0_i32_1 = arith.constant 0 : i32
    return %arg0, %c0_i32, %c0_i32_0 : i32, i32, i32
  }
}

module attributes {stable_mosaic.version = 11 : i64} {
  func.func @_fc_kernel(%arg0: i32, %arg1: memref<1x8x64xf32, #tpu.memory_space<vmem>>, %arg2: memref<64x128xbf16, #tpu.memory_space<vmem>>, %arg3: memref<1x128xf32, #tpu.memory_space<vmem>>, %arg4: memref<1x8x128xf32, #tpu.memory_space<vmem>>) attributes {dimension_semantics = [#tpu.dimension_semantics<parallel>], iteration_bounds = array<i64: 2>, scalar_prefetch = 0 : i64, scratch_operands = 0 : i64, tpu.core_type = #tpu.core_type<tc>, window_params = [{transform_indices = @transform_0, window_bounds = array<i64: 1, 8, 64>}, {pipeline_mode = #tpu.pipeline_mode<synchronous>, transform_indices = @transform_1, window_bounds = array<i64: 64, 128>}, {pipeline_mode = #tpu.pipeline_mode<synchronous>, transform_indices = @transform_2, window_bounds = array<i64: 1, 128>}, {transform_indices = @transform_3, window_bounds = array<i64: 1, 8, 128>}]} {
    %c0 = arith.constant 0 : index
    %c0_0 = arith.constant 0 : index
    %c0_1 = arith.constant 0 : index
    %0 = vector.load %arg1[%c0, %c0_0, %c0_1] : memref<1x8x64xf32, #tpu.memory_space<vmem>>, vector<1x8x64xf32>
    %1 = vector.shape_cast %0 : vector<1x8x64xf32> to vector<8x64xf32>
    %2 = arith.truncf %1 : vector<8x64xf32> to vector<8x64xbf16>
    %c0_2 = arith.constant 0 : index
    %c0_3 = arith.constant 0 : index
    %3 = vector.load %arg2[%c0_2, %c0_3] : memref<64x128xbf16, #tpu.memory_space<vmem>>, vector<64x128xbf16>
    %cst = arith.constant dense<0.000000e+00> : vector<8x128xf32>
    %4 = tpu.matmul %2, %3, %cst {dimension_numbers = #tpu.dot_dimension_numbers<[1], [0], [0], [1], [0, 0, 1, 1], [], []>} : vector<8x64xbf16>, vector<64x128xbf16>, vector<8x128xf32> -> vector<8x128xf32>
    %c0_4 = arith.constant 0 : index
    %c0_5 = arith.constant 0 : index
    %5 = vector.load %arg3[%c0_4, %c0_5] : memref<1x128xf32, #tpu.memory_space<vmem>>, vector<1x128xf32>
    %6 = vector.broadcast %5 : vector<1x128xf32> to vector<8x128xf32>
    %7 = arith.addf %4, %6 : vector<8x128xf32>
    %c0_6 = arith.constant 0 : index
    %c0_7 = arith.constant 0 : index
    %c0_8 = arith.constant 0 : index
    %8 = vector.load %arg4[%c0_6, %c0_7, %c0_8] : memref<1x8x128xf32, #tpu.memory_space<vmem>>, vector<1x8x128xf32>
    %9 = vector.shape_cast %8 : vector<1x8x128xf32> to vector<8x128xf32>
    %10 = vector.shape_cast %7 : vector<8x128xf32> to vector<1x8x128xf32>
    tpu.vector_store %arg4[%c0_6, %c0_7, %c0_8], %10 {strides = array<i32>} : memref<1x8x128xf32, #tpu.memory_space<vmem>>, vector<1x8x128xf32>,
    return
  }
  func.func @transform_0(%arg0: i32) -> (i32, i32, i32) {
    %c0_i32 = arith.constant 0 : i32
    %c0_i32_0 = arith.constant 0 : i32
    %c0_i32_1 = arith.constant 0 : i32
    return %arg0, %c0_i32, %c0_i32_0 : i32, i32, i32
  }
  func.func @transform_1(%arg0: i32) -> (i32, i32) {
    %c0_i32 = arith.constant 0 : i32
    %c0_i32_0 = arith.constant 0 : i32
    %c0_i32_1 = arith.constant 0 : i32
    return %c0_i32, %c0_i32_0 : i32, i32
  }
  func.func @transform_2(%arg0: i32) -> (i32, i32) {
    %c0_i32 = arith.constant 0 : i32
    %c0_i32_0 = arith.constant 0 : i32
    %c0_i32_1 = arith.constant 0 : i32
    return %c0_i32, %c0_i32_0 : i32, i32
  }
  func.func @transform_3(%arg0: i32) -> (i32, i32, i32) {
    %c0_i32 = arith.constant 0 : i32
    %c0_i32_0 = arith.constant 0 : i32
    %c0_i32_1 = arith.constant 0 : i32
    return %arg0, %c0_i32, %c0_i32_0 : i32, i32, i32
  }
}

</mosaic_0001>

<bundles_post_ra>
// kernel: transformer_forward.4
= control target key start
LH: loop header
LB: loop body
LE: loop exit
PB: predicated region body
PF: predicated region fallthrough
CT: control target
= control target key end

     0   :  { %s342_s15 = smov 0   ;;  %s371_s0 = inlined_call_operand.vmem [shape: f32[2,8,10], index: 0, kind: input, shape index: {}]   ;;  %s372_s1 = inlined_call_operand.vmem [shape: bf16[10,64], index: 1, kind: input, shape index: {}]   ;;  %s373_s2 = inlined_call_operand.vmem [shape: f32[1,64], index: 2, kind: input, shape index: {}]   ;;  %s374_s3 = inlined_call_operand.vmem [shape: f32[8,64], index: 3, kind: input, shape index: {}]   ;;  %s375_s4 = inlined_call_operand.vmem [shape: f32[2,8,64], index: 4, kind: output, shape index: {}]  }
   0x1 LB: > { %s285_s16 = sadd.s32 4294967295, %s315_s15   ;;  %p289_p0 = scmp.ge.s32.totalorder %s315_s15, 1  ;;  %s315_s15 = sphi %s342_s15, %s14_s15  }
   0x2   : > { %p161_p1 = scmp.lt.s32.totalorder %s315_s15, 3 }
   0x4   : > { %p162_p2 = pnand %p289_p0, %p161_p1 }
   0x5   : > { %p185_p3 = scmp.lt.s32.totalorder (!%p162_p2), %s285_s16, 1 }
   0x6   : > { %165 = sbr.rel (%p162_p2) target bundleno = 152 (0x98), region = 36 }
   0xb   : > { %v294_v0 = vld [vmem:[%s372_s1] sm:$0xf]  ;;  %v299_v1 = vld [vmem:[%s372_s1] sm:$0x10]  ;;  %vm211_vm0 = vcmask 1044480   ;;  %s377_s16 = smov (!%p185_p3, %s285_s16), 1 }
   0xc   : > { %v295_v2 = vor.u32 %v299_v1, %v294_v0  ;;  %s290_s21 = sshll.u32 %s377_s16, 3  ;;  %vm207_vm1 = vcmask 80896   ;;  %v308_v6 = vld [vmem:[%s373_s2] ss:$0 sm:$0xff]  ;;  %vm230_vm2 = vcmask 523264  }
   0xd   : > { %s188_s24 = scalar_lea.vmem %s371_s0, %s290_s21  ;;  %v228_v8 = vld [vmem:[%s374_s3] sm:$0xff]  ;;  %s192_s5 = scalar_lea.vmem %s375_s4, %s290_s21 }
   0xe   : > { %v213_v3 = vsel %vm211_vm0, %v295_v2, 0  ;;  %v194_v4 = vld [vmem:[%s188_s24] sm:$0xff] }
   0xf   : > { %222 = vmatpush.bf16.msra.mxu0 %v213_v3  ;;  %v195_v5 = vpack.c.bf16 %v194_v4, %v194_v4 }
  0x12   : > { %296 = vmatmul.msk.bf16.vlgmr.msra.gmra.mxu0 %vm207_vm1, %v195_v5 }
  0x8f   : > { %v224_v7 = vpop.f32.mrf.mxu0 }
  0x90   : > { %v225_v9 = vadd.f32 %v308_v6, %v224_v7 }
  0x92   : > { %v229_v10 = vadd.f32 %v228_v8, %v225_v9 }
  0x94   : > { %231 = vst.msk [vmem:[%s192_s5] sm:$0xff] %vm230_vm2, %v229_v10 }
  0x97   : > { %v226_v11 = vpop.f32.mrf.mxu0 }
  0x98 PF: > { %s14_s15 = sadd.s32 1, %s315_s15  }
  0x99   : > { %p11_p4 = scmp.ge.s32.totalorder %s14_s15, 4  }
  0x9b   :  { %13 = sbr.rel (!%p11_p4) target bundleno = 1 (0x1), region = 66 }

// kernel: transformer_forward.7
= control target key start
LH: loop header
LB: loop body
LE: loop exit
PB: predicated region body
PF: predicated region fallthrough
CT: control target
= control target key end

     0   :  { %s343_s12 = smov 0   ;;  %s375_s0 = inlined_call_operand.vmem [shape: f32[2,8,64], index: 0, kind: input, shape index: {}]   ;;  %s376_s1 = inlined_call_operand.vmem [shape: bf16[64,128], index: 1, kind: input, shape index: {}]   ;;  %s377_s2 = inlined_call_operand.vmem [shape: f32[1,128], index: 2, kind: input, shape index: {}]   ;;  %s378_s3 = inlined_call_operand.vmem [shape: f32[2,8,128], index: 3, kind: output, shape index: {}]  }
   0x1 LB: > { %s276_s13 = sadd.s32 4294967295, %s321_s12   ;;  %p280_p0 = scmp.ge.s32.totalorder %s321_s12, 1  ;;  %s321_s12 = sphi %s343_s12, %s13_s12  }
   0x2   : > { %p136_p1 = scmp.lt.s32.totalorder %s321_s12, 3 }
   0x4   : > { %p137_p2 = pnand %p280_p0, %p136_p1 }
   0x5   : > { %p158_p3 = scmp.lt.s32.totalorder (!%p137_p2), %s276_s13, 1 }
   0x6   : > { %140 = sbr.rel (%p137_p2) target bundleno = 161 (0xa1), region = 32 }
   0xb   : > { %v305_v0 = vld [vmem:[%s376_s1 + $0x18] sm:$0xff]  ;;  %v304_v1 = vld [vmem:[%s376_s1 + $0x10] sm:$0xff]  ;;  %s380_s13 = smov (!%p158_p3, %s276_s13), 1  ;;  %v303_v2 = vld [vmem:[%s376_s1 + $0x8] sm:$0xff]  ;;  %vm205_vm0 = vcmask 523264  }
   0xc   : > { %213 = vmatpush.bf16.msra.mxu0 %v305_v0  ;;  %s281_s18 = sshll.u32 %s380_s13, 3  ;;  %v302_v3 = vld [vmem:[%s376_s1] sm:$0xff] }
   0xd   : > { %s161_s23 = scalar_lea.vmem %s375_s0, %s281_s18  ;;  %v314_v6 = vld [vmem:[%s377_s2] ss:$0 sm:$0xff]  ;;  %s165_s30 = scalar_lea.vmem %s378_s3, %s281_s18 }
   0xe   : > { %v167_v4 = vld [vmem:[%s161_s23] sm:$0xff] }
   0xf   : > { %v168_v5 = vpack.c.bf16 %v167_v4, %v167_v4 }
  0x10   : > { %214 = vmatpush.bf16.msra.mxu0 %v304_v1 }
  0x14   : > { %215 = vmatpush.bf16.msra.mxu0 %v303_v2 }
  0x18   : > { %216 = vmatpush.bf16.msra.mxu0 %v302_v3 }
  0x1b   : > { %299 = vmatmul.msk.bf16.vlgmr.msra.gmra.mxu0 %vm205_vm0, %v168_v5 }
  0x98   : > { %v218_v7 = vpop.f32.mrf.mxu0 }
  0x99   : > { %v219_v8 = vadd.f32 %v314_v6, %v218_v7 }
  0x9b   : > { %222 = vst [vmem:[%s165_s30] sm:$0xff] %v219_v8 }
  0xa0   : > { %v220_v9 = vpop.f32.mrf.mxu0 }
  0xa1 PF: > { %s13_s12 = sadd.s32 1, %s321_s12  }
  0xa2   : > { %p10_p4 = scmp.ge.s32.totalorder %s13_s12, 4  }
  0xa4   :  { %12 = sbr.rel (!%p10_p4) target bundleno = 1 (0x1), region = 62 }

// kernel: transformer_forward.5
= control target key start
LH: loop header
LB: loop body
LE: loop exit
PB: predicated region body
PF: predicated region fallthrough
CT: control target
= control target key end

     0   :  { %s4129_s25 = smov 0   ;;  %s5141_s0 = inlined_call_operand.vmem [shape: f32[2,8,64], index: 0, kind: input, shape index: {}]   ;;  %s5142_s1 = inlined_call_operand.vmem [shape: bf16[64,192], index: 1, kind: input, shape index: {}]   ;;  %s5143_s2 = inlined_call_operand.vmem [shape: f32[1,192], index: 2, kind: input, shape index: {}]   ;;  %s5144_s3 = inlined_call_operand.vmem [shape: bf16[64,64], index: 3, kind: input, shape index: {}]   ;;  %s5145_s4 = inlined_call_operand.vmem [shape: f32[1,64], index: 4, kind: input, shape index: {}]   ;;  %s5146_s5 = inlined_call_operand.vmem [shape: f32[1,64], index: 5, kind: input, shape index: {}]   ;;  %s5147_s6 = inlined_call_operand.vmem [shape: f32[1,64], index: 6, kind: input, shape index: {}]   ;;  %s5148_s7 = inlined_call_operand.vmem [shape: bf16[64,2048], index: 7, kind: input, shape index: {}]   ;;  %s5149_s8 = inlined_call_operand.vmem [shape: f32[1,2048], index: 8, kind: input, shape index: {}]   ;;  %s5150_s9 = inlined_call_operand.vmem [shape: bf16[2048,64], index: 9, kind: input, shape index: {}]   ;;  %s5151_s10 = inlined_call_operand.vmem [shape: f32[1,64], index: 10, kind: input, shape index: {}]   ;;  %s5152_s11 = inlined_call_operand.vmem [shape: f32[1,64], index: 11, kind: input, shape index: {}]   ;;  %s5153_s12 = inlined_call_operand.vmem [shape: f32[1,64], index: 12, kind: input, shape index: {}]   ;;  %s5154_s13 = inlined_call_operand.vmem [shape: f32[2,8,64], index: 13, kind: output, shape index: {}]  }
   0x1 LB: > { %s2940_s26 = sadd.s32 4294967295, %s4049_s25   ;;  %p2944_p0 = scmp.ge.s32.totalorder %s4049_s25, 1  ;;  %s4049_s25 = sphi %s4129_s25, %s23_s25  }
   0x2   : > { %p386_p1 = scmp.lt.s32.totalorder %s4049_s25, 3 }
   0x4   : > { %p387_p2 = pnand %p2944_p0, %p386_p1 }
   0x5   : > { %p428_p3 = scmp.lt.s32.totalorder (!%p387_p2), %s2940_s26, 1  ;;  %s4051_s17 = smov (!%p387_p2), 112  }
   0x6   : > { %390 = sbr.rel (%p387_p2) target bundleno = 2378 (0x94a), region = 72  ;;  %s4052_s18 = smov (!%p387_p2), 64  }
   0x7   : > { %s4053_s19 = smov (!%p387_p2), 32   ;;  %s4054_s20 = smov (!%p387_p2), 16  }
   0x8   : > { %s4055_s21 = smov (!%p387_p2), 96   ;;  %s4056_s23 = smov (!%p387_p2), 80  }
   0x9   : > { %s4057_s16 = smov (!%p387_p2), 48  }
   0xb   : > { %v2973_v0 = vld [vmem:[%s5142_s1 + $0x30] sm:$0xf]  ;;  %v3802_v1 = vld [vmem:[%s5142_s1 + $0x34] sm:$0xf0]  ;;  %v2965_v2 = vld [vmem:[%s5142_s1 + $0x20] sm:$0xf] }
   0xc   : > { %v2974_v3 = vor.u32 %v3802_v1, %v2973_v0  ;;  %v3800_v4 = vld [vmem:[%s5142_s1 + $0x24] sm:$0xf0]  ;;  %v2957_v5 = vld [vmem:[%s5142_s1 + $0x10] sm:$0xf]  ;;  %v3798_v7 = vld [vmem:[%s5142_s1 + $0x14] sm:$0xf0] }
   0xd   : > { %v2966_v6 = vor.u32 %v3800_v4, %v2965_v2  ;;  %s5156_s26 = smov (!%p428_p3, %s2940_s26), 1  ;;  %v2958_v8 = vor.u32 %v3798_v7, %v2957_v5  ;;  %v2949_v9 = vld [vmem:[%s5142_s1] sm:$0xf]  ;;  %v3796_v10 = vld [vmem:[%s5142_s1 + $0x4] sm:$0xf0]  ;;  %vm493_vm0 = vcmask 523264  }
   0xe   : > { %501 = vmatpush.bf16.msra.mxu0 %v2974_v3  ;;  %s2945_s22 = sshll.u32 %s5156_s26, 3  ;;  %v2950_v11 = vor.u32 %v3796_v10, %v2949_v9  ;;  %v4177_v14 = vld [vmem:[%s5143_s2] sm:$0x3]  ;;  %v3801_v20 = vld [vmem:[%s5142_s1 + $0x34] sm:$0xf]  ;;  %vm528_vm1 = vcmask 130048  }
   0xf   : > { %s431_s14 = scalar_lea.vmem %s5141_s0, %s2945_s22  ;;  %v449_v15 = vperm.slane %v4177_v14, 0  ;;  %v2975_v21 = vld [vmem:[%s5142_s1 + $0x38] sm:$0xf0]  ;;  %v3799_v23 = vld [vmem:[%s5142_s1 + $0x24] sm:$0xf]  ;;  %vm549_vm2 = vcmask 64512  }
  0x10   : > { %v4169_v12 = vld [vmem:[%s431_s14] sm:$0xff]  ;;  %v2978_v22 = vor.u32 %v3801_v20, %v2975_v21  ;;  %v2967_v24 = vld [vmem:[%s5142_s1 + $0x28] sm:$0xf0]  ;;  %v3797_v26 = vld [vmem:[%s5142_s1 + $0x14] sm:$0xf]  ;;  %v450_v49 = vperm.slane %v4177_v14, 1 }
  0x11   : > { %v438_v13 = vpack.c.bf16 %v4169_v12, %v4169_v12  ;;  %v2970_v25 = vor.u32 %v3799_v23, %v2967_v24  ;;  %v2959_v27 = vld [vmem:[%s5142_s1 + $0x18] sm:$0xf0]  ;;  %v3795_v29 = vld [vmem:[%s5142_s1 + $0x4] sm:$0xf]  ;;  %v2951_v30 = vld [vmem:[%s5142_s1 + $0x8] sm:$0xf0] }
  0x12   : > { %502 = vmatpush.bf16.msra.mxu0 %v2966_v6  ;;  %514 = vmatpush.bf16.msra.mxu1 %v2978_v22  ;;  %v2962_v28 = vor.u32 %v3797_v26, %v2959_v27  ;;  %v2954_v31 = vor.u32 %v3795_v29, %v2951_v30  ;;  %v3803_v32 = vld [vmem:[%s5144_s3] sm:$0xff]  ;;  %vm578_vm3 = vcmask 1043456  }
  0x16   : > { %503 = vmatpush.bf16.msra.mxu0 %v2958_v8  ;;  %515 = vmatpush.bf16.msra.mxu1 %v2970_v25 }
  0x1a   : > { %504 = vmatpush.bf16.msra.mxu0 %v2950_v11  ;;  %516 = vmatpush.bf16.msra.mxu1 %v2962_v28 }
  0x1d   : > { %2979 = vmatmul.msk.bf16.vlgmr.msra.gmra.mxu0 %vm493_vm0, %v438_v13 }
  0x1e   : > { %517 = vmatpush.bf16.msra.mxu1 %v2954_v31 }
  0x21   : > { %2980 = vmatmul.msk.bf16.vlgmr.msra.gmra.mxu1 %vm493_vm0, %v438_v13 }
  0x22   : > { %710 = vmatpush.bf16.msrb.mxu1 %v3803_v32 }
  0x9a   : > { %v506_v16 = vpop.f32.mrf.mxu0 }
  0x9b   : > { %v507_v17 = vadd.f32 %v506_v16, %v449_v15 }
  0x9d   : > { %v523_v18 = vpack.c.bf16 %v507_v17, %v507_v17 }
  0x9e   : > { %v519_v48 = vpop.f32.mrf.mxu1 }
  0x9f   : > { %598 = vrot.lane.b32.xlu2 %v523_v18, %s4051_s17  ;;  %526 = vrot.lane.b32.xlu0 %v523_v18, %s4052_s18  ;;  %v520_v51 = vadd.f32 %v519_v48, %v450_v49 }
  0xa1   : > { %v4217_v52 = vpack.c.bf16 %v520_v51, %v520_v51 }
  0xa2   : > { %v508_v19 = vpop.f32.mrf.mxu0 }
  0xa3   : > { %v580_v53 = vsel %vm578_vm3, %v4217_v52, 0 }
  0xa4   : > { %589 = vmatpush.bf16.msra.mxu3 %v580_v53 }
  0xa6   : > { %v521_v50 = vpop.f32.mrf.mxu1 }
  0xa7   : > { %718 = vrot.lane.b32.xlu2 %v523_v18, %s4053_s19  ;;  %s435_s19 = scalar_lea.vmem %s5154_s13, %s2945_s22 }
  0xaf   : > { %814 = vrot.lane.b32.xlu2 %v523_v18, %s4054_s20 }
  0xb7   : > { %716 = vrot.lane.b32.xlu2 %v523_v18, %s4055_s21 }
  0xbf   : > { %812 = vrot.lane.b32.xlu2 %v523_v18, %s4056_s23 }
  0xf9   : > { %v599_v33 = vpop.permute.xlu2 %598 }
 0x101   : > { %v719_v34 = vpop.permute.xlu2 %718 }
 0x102   : > { %v724_v5 = vsel %vm528_vm1, %v719_v34, 0 }
 0x109   : > { %v815_v35 = vpop.permute.xlu2 %814 }
 0x10a   : > { %v820_v36 = vsel %vm528_vm1, %v815_v35, 0 }
 0x10b   : > { %829 = vmatpush.bf16.xpose.msra.mxu1 %v820_v36 }
 0x111   : > { %v527_v37 = vpop.permute.xlu0 %526  ;;  %v717_v6 = vpop.permute.xlu2 %716 }
 0x112   : > { %v533_v38 = vsel %vm528_vm1, %v527_v37, 0 }
 0x113   : > { %542 = vmatpush.bf16.xpose.msra.mxu2 %v533_v38 }
 0x119   : > { %v813_v13 = vpop.permute.xlu2 %812 }
 0x11a   : > { %2981 = vmatmul.msk.bf16.vlgmr.msra.gmra.mxu2 %vm528_vm1, %v523_v18 }
 0x19d   : > { %v544_v39 = vpop.f32.mrf.mxu2 }
 0x19e   : > { %v548_v40 = vmul.f32 0.25, %v544_v39 }
 0x1a0   : > { %v550_v41 = vsel %vm549_vm2, %v548_v40, -inf }
 0x1a1   : > { %551 = vmax.xlane.f32.xlu0 %v550_v41 }
 0x1a5   : > { %v546_v42 = vpop.f32.mrf.mxu2 }
 0x214   : > { %v552_v43 = vpop.xlane.xlu0 %551 }
 0x215   : > { %v553_v44 = vsub.f32 %v548_v40, %v552_v43 }
 0x217   : > { %v554_v45 = vmul.f32 1.442695, %v553_v44 }
 0x219   : > { %4021 = vpow2.f32 %v554_v45 }
 0x21f   : > { %v4022_v46 = vpop.eup %4021 }
 0x220   : > { %v556_v47 = vsel %vm549_vm2, %v4022_v46, 0.0 }
 0x221   : > { %557 = vadd.xlane.f32.xlu1 %v556_v47 }
 0x23a   : > { %600 = vrot.lane.b32.xlu1 %v523_v18, %s4057_s16 }
 0x294   : > { %v558_v54 = vpop.xlane.xlu1 %557 }
 0x295   : > { %4023 = vrcp.f32 %v558_v54  ;;  %v570_v58 = vand.u32 2147483648, %v558_v54  ;;  %v568_v60 = vand.u32 2147483647, %v558_v54  ;;  %vm564_vm5 = vweird.f32 %v558_v54 }
 0x297   : > { %v571_v62 = vor.u32 1.1754944e-38, %v570_v58  ;;  %vm569_vm7 = vcmp.eq.f32.partialorder %v568_v60, 8.507059e+37  ;;  %v3804_v60 = vld [vmem:[%s5144_s3 + $0x8] sm:$0xff] }
 0x298   : > { %688 = vmatpush.bf16.msrb.mxu0 %v3804_v60  ;;  %v3203_v60 = vld [vmem:[%s5148_s7 + $0x180] sm:$0xf] }
 0x29b   : > { %v4024_v55 = vpop.eup %4023 }
 0x29c   : > { %v560_v56 = vmul.f32 %v4024_v55, %v558_v54  ;;  %vm565_vm4 = vweird.f32 %v4024_v55 }
 0x29d   : > { %vm566_vm6 = vmor %vm564_vm5, %vm565_vm4 }
 0x29e   : > { %v561_v57 = vsub.f32 1.0, %v560_v56 }
 0x2a0   : > { %v562_v59 = vmul.f32 %v4024_v55, %v561_v57 }
 0x2a2   : > { %v563_v61 = vadd.f32 %v4024_v55, %v562_v59 }
 0x2a4   : > { %v567_v63 = vsel %vm566_vm6, %v4024_v55, %v563_v61 }
 0x2a5   : > { %v572_v0 = vsel %vm569_vm7, %v571_v62, %v567_v63 }
 0x2a6   : > { %v573_v1 = vmul.f32 %v4022_v46, %v572_v0 }
 0x2a8   : > { %v574_v2 = vpack.c.bf16 %v573_v1, %v573_v1 }
 0x2aa   : > { %2982 = vmatmul.msk.bf16.vlgmr.msra.gmra.mxu3 %vm549_vm2, %v574_v2 }
 0x2ac   : > { %v601_v3 = vpop.permute.xlu1 %600 }
 0x2ad   : > { %v606_v4 = vsel %vm528_vm1, %v601_v3, 0 }
 0x2ae   : > { %615 = vmatpush.bf16.xpose.msrb.mxu3 %v606_v4 }
 0x2b6   : > { %733 = vmatpush.bf16.xpose.msra.mxu3 %v724_v5 }
 0x2ba   : > { %2983 = vmatmul.msk.bf16.vlgmr.msrb.gmra.mxu3 %vm528_vm1, %v599_v33 }
 0x2ca   : > { %2995 = vmatmul.msk.bf16.vlgmr.msra.gmra.mxu3 %vm528_vm1, %v717_v6 }
 0x32d   : > { %v591_v7 = vpop.f32.mrf.mxu3 }
 0x32e   : > { %v597_v8 = vpack.c.bf16 %v591_v7, %v591_v7 }
 0x330   : > { %2994 = vmatmul.msk.bf16.vlgmr.msrb.gmra.mxu1 %vm528_vm1, %v597_v8 }
 0x335   : > { %v593_v9 = vpop.f32.mrf.mxu3 }
 0x33d   : > { %v617_v10 = vpop.f32.mrf.mxu3 }
 0x33e   : > { %v621_v11 = vmul.f32 0.25, %v617_v10 }
 0x340   : > { %3002 = vmatmul.msk.bf16.vlgmr.msra.gmra.mxu1 %vm528_vm1, %v813_v13  ;;  %v622_v14 = vsel %vm549_vm2, %v621_v11, -inf }
 0x341   : > { %623 = vmax.xlane.f32.xlu1 %v622_v14 }
 0x345   : > { %v619_v15 = vpop.f32.mrf.mxu3 }
 0x34d   : > { %v735_v16 = vpop.f32.mrf.mxu3 }
 0x34e   : > { %v739_v17 = vmul.f32 0.25, %v735_v16 }
 0x350   : > { %v740_v18 = vsel %vm549_vm2, %v739_v17, -inf }
 0x351   : > { %741 = vmax.xlane.f32.xlu0 %v740_v18 }
 0x355   : > { %v737_v19 = vpop.f32.mrf.mxu3 }
 0x35a   : > { %648 = vrot.lane.b32.xlu1 %v4217_v52, %s4051_s17 }
 0x3ad   : > { %v4232_v20 = vpop.f32.mrf.mxu1 }
 0x3b4   : > { %v624_v21 = vpop.xlane.xlu1 %623 }
 0x3b5   : > { %v625_v22 = vsub.f32 %v621_v11, %v624_v21  ;;  %v714_v23 = vpop.f32.mrf.mxu1  ;;  %v3806_v21 = vld [vmem:[%s5144_s3 + $0x18] sm:$0xff] }
 0x3b7   : > { %v626_v24 = vmul.f32 1.442695, %v625_v22 }
 0x3b9   : > { %4025 = vpow2.f32 %v626_v24 }
 0x3bd   : > { %v831_v25 = vpop.f32.mrf.mxu1 }
 0x3be   : > { %v835_v26 = vmul.f32 0.25, %v831_v25 }
 0x3bf   : > { %v4026_v27 = vpop.eup %4025 }
 0x3c0   : > { %v836_v28 = vsel %vm549_vm2, %v835_v26, -inf  ;;  %v628_v29 = vsel %vm549_vm2, %v4026_v27, 0.0 }
 0x3c1   : > { %837 = vmax.xlane.f32.xlu2 %v836_v28  ;;  %629 = vadd.xlane.f32.xlu0 %v628_v29  ;;  %v3805_v29 = vld [vmem:[%s5144_s3 + $0x10] sm:$0xff] }
 0x3c2   : > { %805 = vmatpush.bf16.msra.mxu0 %v3805_v29 }
 0x3c4   : > { %v742_v30 = vpop.xlane.xlu0 %741 }
 0x3c5   : > { %v743_v31 = vsub.f32 %v739_v17, %v742_v30  ;;  %v833_v32 = vpop.f32.mrf.mxu1 }
 0x3c7   : > { %v744_v33 = vmul.f32 1.442695, %v743_v31 }
 0x3c9   : > { %4027 = vpow2.f32 %v744_v33 }
 0x3cc   : > { %v649_v34 = vpop.permute.xlu1 %648 }
 0x3cd   : > { %v654_v35 = vsel %vm578_vm3, %v649_v34, 0 }
 0x3ce   : > { %663 = vmatpush.bf16.msrb.mxu2 %v654_v35 }
 0x3cf   : > { %v4237_v36 = vpop.eup %4027 }
 0x3d0   : > { %v746_v37 = vsel %vm549_vm2, %v4237_v36, 0.0 }
 0x3d1   : > { %747 = vadd.xlane.f32.xlu0 %v746_v37 }
 0x3d9   : > { %861 = vrot.lane.b32.xlu2 %v4217_v52, %s4056_s23 }
 0x434   : > { %v838_v38 = vpop.xlane.xlu2 %837  ;;  %v630_v39 = vpop.xlane.xlu0 %629 }
 0x435   : > { %v839_v40 = vsub.f32 %v835_v26, %v838_v38  ;;  %4029 = vrcp.f32 %v630_v39  ;;  %v642_v49 = vand.u32 2147483648, %v630_v39  ;;  %v640_v51 = vand.u32 2147483647, %v630_v39 }
 0x436   : > { %vm636_vm9 = vweird.f32 %v630_v39 }
 0x437   : > { %v840_v41 = vmul.f32 1.442695, %v839_v40  ;;  %v643_v54 = vor.u32 1.1754944e-38, %v642_v49  ;;  %vm641_vm11 = vcmp.eq.f32.partialorder %v640_v51, 8.507059e+37  ;;  %v4058_v49 = vmov 64.0  }
 0x439   : > { %4031 = vpow2.f32 %v840_v41  ;;  %v4015_v41 = vld [vmem:[%s5145_s4] ss:$0 sm:$0xff] }
 0x43b   : > { %v4030_v42 = vpop.eup %4029 }
 0x43c   : > { %v632_v43 = vmul.f32 %v4030_v42, %v630_v39  ;;  %v862_v44 = vpop.permute.xlu2 %861  ;;  %vm637_vm8 = vweird.f32 %v4030_v42 }
 0x43d   : > { %v867_v45 = vsel %vm578_vm3, %v862_v44, 0  ;;  %vm638_vm10 = vmor %vm636_vm9, %vm637_vm8 }
 0x43e   : > { %v633_v46 = vsub.f32 1.0, %v632_v43  ;;  %876 = vmatpush.bf16.msrb.mxu3 %v867_v45 }
 0x43f   : > { %v4032_v47 = vpop.eup %4031 }
 0x440   : > { %v634_v48 = vmul.f32 %v4030_v42, %v633_v46  ;;  %v842_v50 = vsel %vm549_vm2, %v4032_v47, 0.0 }
 0x441   : > { %843 = vadd.xlane.f32.xlu0 %v842_v50 }
 0x442   : > { %v635_v53 = vadd.f32 %v4030_v42, %v634_v48 }
 0x444   : > { %v639_v55 = vsel %vm638_vm10, %v4030_v42, %v635_v53  ;;  %v748_v59 = vpop.xlane.xlu0 %747 }
 0x445   : > { %v644_v56 = vsel %vm641_vm11, %v643_v54, %v639_v55  ;;  %4033 = vrcp.f32 %v748_v59  ;;  %v760_v5 = vand.u32 2147483648, %v748_v59  ;;  %vm754_vm13 = vweird.f32 %v748_v59 }
 0x446   : > { %v645_v57 = vmul.f32 %v4026_v27, %v644_v56 }
 0x447   : > { %v761_v11 = vor.u32 1.1754944e-38, %v760_v5  ;;  %v3856_v5 = vld [vmem:[%s5148_s7 + $0x18c] sm:$0xf] }
 0x448   : > { %v646_v58 = vpack.c.bf16 %v645_v57, %v645_v57 }
 0x44a   : > { %2984 = vmatmul.msk.bf16.vlgmr.msrb.gmra.mxu2 %vm549_vm2, %v646_v58 }
 0x44b   : > { %v4034_v61 = vpop.eup %4033 }
 0x44c   : > { %v750_v62 = vmul.f32 %v4034_v61, %v748_v59  ;;  %vm755_vm12 = vweird.f32 %v4034_v61 }
 0x44d   : > { %vm756_vm14 = vmor %vm754_vm13, %vm755_vm12 }
 0x44e   : > { %v751_v63 = vsub.f32 1.0, %v750_v62  ;;  %v3855_v62 = vld [vmem:[%s5148_s7 + $0x184] sm:$0xf] }
 0x450   : > { %v752_v1 = vmul.f32 %v4034_v61, %v751_v63 }
 0x452   : > { %v753_v3 = vadd.f32 %v4034_v61, %v752_v1  ;;  %v3211_v1 = vld [vmem:[%s5148_s7 + $0x188] sm:$0xf] }
 0x454   : > { %v757_v8 = vsel %vm756_vm14, %v4034_v61, %v753_v3  ;;  %v3863_v61 = vld [vmem:[%s5148_s7 + $0x1bc] sm:$0xf0] }
 0x455   : > { %765 = vrot.lane.b32.xlu0 %v4217_v52, %s4055_s21  ;;  %v758_v52 = vand.u32 2147483647, %v748_v59  ;;  %v3204_v63 = vor.u32 %v3863_v61, %v3203_v60  ;;  %v3849_v61 = vld [vmem:[%s5148_s7 + $0x14c] sm:$0xf0] }
 0x457   : > { %vm759_vm4 = vcmp.eq.f32.partialorder %v758_v52, 8.507059e+37  ;;  %v3213_v52 = vld [vmem:[%s5148_s7 + $0x1c8] sm:$0xf0] }
 0x458   : > { %v762_v14 = vsel %vm759_vm4, %v761_v11, %v757_v8  ;;  %v3847_v8 = vld [vmem:[%s5148_s7 + $0x13c] sm:$0xf0]  ;;  %v3141_v11 = vld [vmem:[%s5148_s7 + $0x140] sm:$0xf0] }
 0x459   : > { %v763_v18 = vmul.f32 %v4237_v36, %v762_v14  ;;  %v3848_v14 = vld [vmem:[%s5148_s7 + $0x144] sm:$0xf0] }
 0x45b   : > { %v764_v25 = vpack.c.bf16 %v763_v18, %v763_v18  ;;  %v3149_v18 = vld [vmem:[%s5148_s7 + $0x148] sm:$0xf0] }
 0x4b4   : > { %v844_v0 = vpop.xlane.xlu0 %843 }
 0x4b5   : > { %4035 = vrcp.f32 %v844_v0  ;;  %v856_v7 = vand.u32 2147483648, %v844_v0  ;;  %v854_v10 = vand.u32 2147483647, %v844_v0  ;;  %vm850_vm5 = vweird.f32 %v844_v0 }
 0x4b6   : > { %4037 = vrcp.f32 %v4058_v49  ;;  %v3221_v49 = vld [vmem:[%s5148_s7 + $0x1d0] sm:$0xf0] }
 0x4b7   : > { %v857_v15 = vor.u32 1.1754944e-38, %v856_v7  ;;  %vm855_vm7 = vcmp.eq.f32.partialorder %v854_v10, 8.507059e+37  ;;  %v3139_v7 = vld [vmem:[%s5148_s7 + $0x100] sm:$0xf] }
 0x4b8   : > { %v3140_v10 = vor.u32 %v3847_v8, %v3139_v7  ;;  %v3091_v7 = vld [vmem:[%s5148_s7 + $0x90] sm:$0xf] }
 0x4bb   : > { %v4036_v2 = vpop.eup %4035 }
 0x4bc   : > { %v846_v4 = vmul.f32 %v4036_v2, %v844_v0  ;;  %vm851_vm15 = vweird.f32 %v4036_v2  ;;  %v4038_v50 = vpop.eup %4037  ;;  %v3205_v0 = vld [vmem:[%s5148_s7 + $0x1c0] sm:$0xf0] }
 0x4bd   : > { %vm852_vm6 = vmor %vm850_vm5, %vm851_vm15  ;;  %v920_v51 = vmul.f32 64.0, %v4038_v50  ;;  %v3208_v3 = vor.u32 %v3855_v62, %v3205_v0  ;;  %v3841_v62 = vld [vmem:[%s5148_s7 + $0x114] sm:$0xf] }
 0x4be   : > { %v847_v6 = vsub.f32 1.0, %v846_v4 }
 0x4bf   : > { %1394 = vmatpush.bf16.msrb.mxu1 %v3208_v3  ;;  %v3850_v3 = vld [vmem:[%s5148_s7 + $0x154] sm:$0xf0] }
 0x4c0   : > { %v848_v9 = vmul.f32 %v4036_v2, %v847_v6  ;;  %v3216_v6 = vor.u32 %v3856_v5, %v3213_v52 }
 0x4c2   : > { %v849_v13 = vadd.f32 %v4036_v2, %v848_v9  ;;  %v3839_v9 = vld [vmem:[%s5148_s7 + $0x104] sm:$0xf] }
 0x4c4   : > { %v853_v16 = vsel %vm852_vm6, %v4036_v2, %v849_v13  ;;  %v3864_v2 = vld [vmem:[%s5148_s7 + $0x1c4] sm:$0xf0] }
 0x4c5   : > { %v858_v17 = vsel %vm855_vm7, %v857_v15, %v853_v16  ;;  %v3212_v4 = vor.u32 %v3864_v2, %v3211_v1  ;;  %v3147_v13 = vld [vmem:[%s5148_s7 + $0x108] sm:$0xf]  ;;  %v3144_v15 = vor.u32 %v3839_v9, %v3141_v11  ;;  %v3163_v2 = vld [vmem:[%s5148_s7 + $0x118] sm:$0xf]  ;;  %v3833_v9 = vld [vmem:[%s5148_s7 + $0xcc] sm:$0xf0] }
 0x4c6   : > { %v859_v19 = vmul.f32 %v4032_v47, %v858_v17  ;;  %v3148_v16 = vor.u32 %v3848_v14, %v3147_v13  ;;  %v3840_v17 = vld [vmem:[%s5148_s7 + $0x10c] sm:$0xf]  ;;  %v3164_v52 = vor.u32 %v3850_v3, %v3163_v2  ;;  %v3093_v11 = vld [vmem:[%s5148_s7 + $0xd0] sm:$0xf0]  ;;  %v3092_v13 = vor.u32 %v3833_v9, %v3091_v7  ;;  %v3099_v14 = vld [vmem:[%s5148_s7 + $0x98] sm:$0xf] }
 0x4c7   : > { %v766_v22 = vpop.permute.xlu0 %765  ;;  %1407 = vmatpush.bf16.msra.mxu3 %v3212_v4  ;;  %1395 = vmatpush.bf16.msrb.mxu1 %v3144_v15  ;;  %v3842_v4 = vld [vmem:[%s5148_s7 + $0x11c] sm:$0xf]  ;;  %v3834_v15 = vld [vmem:[%s5148_s7 + $0xd4] sm:$0xf0]  ;;  %v3181_v2 = vld [vmem:[%s5148_s7 + $0x168] sm:$0xf0] }
 0x4c8   : > { %v771_v23 = vsel %vm578_vm3, %v766_v22, 0  ;;  %v860_v24 = vpack.c.bf16 %v859_v19, %v859_v19  ;;  %v3152_v19 = vor.u32 %v3840_v17, %v3149_v18  ;;  %v3831_v22 = vld [vmem:[%s5148_s7 + $0xbc] sm:$0xf0]  ;;  %v3100_v18 = vor.u32 %v3834_v15, %v3099_v14  ;;  %v3109_v9 = vld [vmem:[%s5148_s7 + $0xe0] sm:$0xf0] }
 0x4c9   : > { %780 = vmatpush.bf16.msra.mxu2 %v771_v23  ;;  %v3823_v23 = vld [vmem:[%s5148_s7 + $0x84] sm:$0xf]  ;;  %v3117_v14 = vld [vmem:[%s5148_s7 + $0xe8] sm:$0xf0] }
 0x4ca   : > { %3003 = vmatmul.msk.bf16.vlgmr.msrb.gmra.mxu3 %vm549_vm2, %v860_v24 }
 0x4cb   : > { %1408 = vmatpush.bf16.msra.mxu3 %v3148_v16  ;;  %v3826_v16 = vld [vmem:[%s5148_s7 + $0x9c] sm:$0xf] }
 0x4cc   : > { %2996 = vmatmul.msk.bf16.vlgmr.msra.gmra.mxu2 %vm549_vm2, %v764_v25  ;;  %v3077_v25 = vld [vmem:[%s5148_s7 + $0xc0] sm:$0xf0] }
 0x4cd   : > { %901 = vmatpush.bf16.msrb.mxu2 %v3806_v21  ;;  %v665_v26 = vpop.f32.mrf.mxu2  ;;  %v3075_v21 = vld [vmem:[%s5148_s7 + $0x80] sm:$0xf] }
 0x4ce   : > { %v671_v27 = vpack.c.bf16 %v665_v26, %v665_v26  ;;  %v3076_v24 = vor.u32 %v3831_v22, %v3075_v21  ;;  %v3083_v26 = vld [vmem:[%s5148_s7 + $0x88] sm:$0xf]  ;;  %v3027_v21 = vld [vmem:[%s5148_s7 + $0x10] sm:$0xf] }
 0x4cf   : > { %v3817_v22 = vld [vmem:[%s5148_s7 + $0x4c] sm:$0xf0] }
 0x4d0   : > { %2989 = vmatmul.msk.bf16.vlgmr.msrb.gmra.mxu0 %vm528_vm1, %v671_v27  ;;  %v3832_v27 = vld [vmem:[%s5148_s7 + $0xc4] sm:$0xf0] }
 0x4d1   : > { %1381 = vmatpush.bf16.msrb.mxu0 %v3204_v63  ;;  %1420 = vmatpush.bf16.msra.mxu2 %v3216_v6  ;;  %v3084_v29 = vor.u32 %v3832_v27, %v3083_v26  ;;  %v3157_v63 = vld [vmem:[%s5148_s7 + $0x150] sm:$0xf0]  ;;  %v3165_v6 = vld [vmem:[%s5148_s7 + $0x158] sm:$0xf0]  ;;  %v3035_v26 = vld [vmem:[%s5148_s7 + $0x18] sm:$0xf] }
 0x4d2   : > { %v3160_v1 = vor.u32 %v3841_v62, %v3157_v63  ;;  %v3168_v8 = vor.u32 %v3842_v4, %v3165_v6  ;;  %v3818_v27 = vld [vmem:[%s5148_s7 + $0x54] sm:$0xf0]  ;;  %v3173_v62 = vld [vmem:[%s5148_s7 + $0x160] sm:$0xf0]  ;;  %v3179_v63 = vld [vmem:[%s5148_s7 + $0x128] sm:$0xf] }
 0x4d3   : > { %1409 = vmatpush.bf16.msra.mxu3 %v3084_v29  ;;  %v3037_v29 = vld [vmem:[%s5148_s7 + $0x58] sm:$0xf0] }
 0x4d5   : > { %v667_v28 = vpop.f32.mrf.mxu2  ;;  %1382 = vmatpush.bf16.msrb.mxu0 %v3140_v10  ;;  %1421 = vmatpush.bf16.msra.mxu2 %v3152_v19  ;;  %v3825_v10 = vld [vmem:[%s5148_s7 + $0x94] sm:$0xf]  ;;  %v3101_v19 = vld [vmem:[%s5148_s7 + $0xd8] sm:$0xf0] }
 0x4d6   : > { %v3080_v28 = vor.u32 %v3823_v23, %v3077_v25  ;;  %v3096_v17 = vor.u32 %v3825_v10, %v3093_v11  ;;  %v3104_v23 = vor.u32 %v3826_v16, %v3101_v19  ;;  %v3029_v25 = vld [vmem:[%s5148_s7 + $0x50] sm:$0xf0]  ;;  %v3115_v10 = vld [vmem:[%s5148_s7 + $0xa8] sm:$0xf] }
 0x4d7   : > { %v3836_v11 = vld [vmem:[%s5148_s7 + $0xe4] sm:$0xf0] }
 0x4d8   : > { %1396 = vmatpush.bf16.msrb.mxu1 %v3080_v28  ;;  %v3810_v28 = vld [vmem:[%s5148_s7 + $0x1c] sm:$0xf]  ;;  %v3116_v19 = vor.u32 %v3836_v11, %v3115_v10  ;;  %v3822_v10 = vld [vmem:[%s5148_s7 + $0x74] sm:$0xf0] }
 0x4d9   : > { %1383 = vmatpush.bf16.msrb.mxu0 %v3076_v24  ;;  %v3809_v24 = vld [vmem:[%s5148_s7 + $0x14] sm:$0xf]  ;;  %v3814_v11 = vld [vmem:[%s5148_s7 + $0x3c] sm:$0xf] }
 0x54d   : > { %v878_v30 = vpop.f32.mrf.mxu3  ;;  %v690_v31 = vpop.f32.mrf.mxu0 }
 0x54e   : > { %v884_v32 = vpack.c.bf16 %v878_v30, %v878_v30  ;;  %v713_v39 = vadd.f32 %v4232_v20, %v690_v31  ;;  %v921_v20 = vsub.f32 1.0, %v920_v51  ;;  %v3824_v30 = vld [vmem:[%s5148_s7 + $0x8c] sm:$0xf]  ;;  %v3866_v51 = vld [vmem:[%s5148_s7 + $0x1d4] sm:$0xf0] }
 0x54f   : > { %v782_v33 = vpop.f32.mrf.mxu2  ;;  %v3085_v31 = vld [vmem:[%s5148_s7 + $0xc8] sm:$0xf0] }
 0x550   : > { %v788_v34 = vpack.c.bf16 %v782_v33, %v782_v33  ;;  %3008 = vmatmul.msk.bf16.vlgmr.msrb.gmra.mxu2 %vm528_vm1, %v884_v32  ;;  %v922_v53 = vmul.f32 %v4038_v50, %v921_v20  ;;  %v3088_v32 = vor.u32 %v3824_v30, %v3085_v31  ;;  %v3011_v33 = vld [vmem:[%s5148_s7] sm:$0xf]  ;;  %v3028_v30 = vor.u32 %v3817_v22, %v3027_v21  ;;  %v3811_v22 = vld [vmem:[%s5148_s7 + $0x24] sm:$0xf] }
 0x551   : > { %v3032_v31 = vor.u32 %v3809_v24, %v3029_v25  ;;  %v3051_v24 = vld [vmem:[%s5148_s7 + $0x28] sm:$0xf] }
 0x552   : > { %3001 = vmatmul.msk.bf16.vlgmr.msra.gmra.mxu0 %vm528_vm1, %v788_v34  ;;  %v923_v54 = vadd.f32 %v4038_v50, %v922_v53  ;;  %vm924_vm1 = vweird.f32 %v4038_v50  ;;  %v3815_v34 = vld [vmem:[%s5148_s7 + $0x3c] sm:$0xf0]  ;;  %1422 = vmatpush.bf16.msra.mxu2 %v3088_v32  ;;  %v3036_v32 = vor.u32 %v3818_v27, %v3035_v26  ;;  %v3820_v25 = vld [vmem:[%s5148_s7 + $0x64] sm:$0xf0]  ;;  %v3812_v26 = vld [vmem:[%s5148_s7 + $0x2c] sm:$0xf] }
 0x553   : > { %v3053_v27 = vld [vmem:[%s5148_s7 + $0x68] sm:$0xf0] }
 0x554   : > { %v4270_v55 = vsel %vm924_vm1, %v4038_v50, %v923_v54  ;;  %v3227_v50 = vld [vmem:[%s5148_s7 + $0x198] sm:$0xf] }
 0x555   : > { %v880_v35 = vpop.f32.mrf.mxu3  ;;  %v692_v36 = vpop.f32.mrf.mxu0  ;;  %v3228_v54 = vor.u32 %v3866_v51, %v3227_v50  ;;  %v3868_v50 = vld [vmem:[%s5148_s7 + $0x1e4] sm:$0xf0]  ;;  %v3860_v51 = vld [vmem:[%s5148_s7 + $0x1ac] sm:$0xf] }
 0x556   : > { %v3807_v35 = vld [vmem:[%s5148_s7 + $0x4] sm:$0xf]  ;;  %v3012_v36 = vor.u32 %v3815_v34, %v3011_v33  ;;  %v3040_v34 = vor.u32 %v3810_v28, %v3037_v29 }
 0x557   : > { %v784_v37 = vpop.f32.mrf.mxu2 }
 0x558   : > { %v3013_v37 = vld [vmem:[%s5148_s7 + $0x40] sm:$0xf0]  ;;  %1384 = vmatpush.bf16.msrb.mxu0 %v3012_v36 }
 0x5cf   : > { %v807_v38 = vpop.f32.mrf.mxu0 }
 0x5d0   : > { %v811_v40 = vadd.f32 %v807_v38, %v713_v39  ;;  %v3019_v38 = vld [vmem:[%s5148_s7 + $0x8] sm:$0xf] }
 0x5d1   : > { %v3816_v39 = vld [vmem:[%s5148_s7 + $0x44] sm:$0xf0] }
 0x5d3   : > { %v903_v42 = vpop.f32.mrf.mxu2 }
 0x5d4   : > { %v907_v43 = vadd.f32 %v903_v42, %v811_v40  ;;  %v3016_v40 = vor.u32 %v3807_v35, %v3013_v37  ;;  %v3808_v42 = vld [vmem:[%s5148_s7 + $0xc] sm:$0xf] }
 0x5d6   : > { %v912_v44 = vadd.f32 %v4015_v41, %v907_v43  ;;  %v3020_v41 = vor.u32 %v3816_v39, %v3019_v38  ;;  %v3021_v43 = vld [vmem:[%s5148_s7 + $0x48] sm:$0xf0]  ;;  %1397 = vmatpush.bf16.msrb.mxu1 %v3016_v40  ;;  %v4016_v40 = vld [vmem:[%s5146_s5] ss:$0 sm:$0xff] }
 0x5d7   : > { %v809_v45 = vpop.f32.mrf.mxu0 }
 0x5d8   : > { %v913_v46 = vadd.f32 %v912_v44, %v4169_v12  ;;  %v3024_v44 = vor.u32 %v3808_v42, %v3021_v43  ;;  %1410 = vmatpush.bf16.msra.mxu3 %v3020_v41  ;;  %v3219_v45 = vld [vmem:[%s5148_s7 + $0x190] sm:$0xf]  ;;  %v4017_v42 = vld [vmem:[%s5147_s6] ss:$0 sm:$0xff] }
 0x5da   : > { %v916_v47 = vsel %vm493_vm0, %v913_v46, 0.0  ;;  %1423 = vmatpush.bf16.msra.mxu2 %v3024_v44 }
 0x5db   : > { %917 = vadd.xlane.f32.xlu1 %v916_v47  ;;  %v905_v48 = vpop.f32.mrf.mxu2  ;;  %v3857_v47 = vld [vmem:[%s5148_s7 + $0x194] sm:$0xf] }
 0x5dc   : > { %v3224_v53 = vor.u32 %v3857_v47, %v3221_v49  ;;  %1459 = vmatpush.bf16.msrb.mxu3 %v3228_v54  ;;  %v3859_v47 = vld [vmem:[%s5148_s7 + $0x1a4] sm:$0xf] }
 0x5de   : > { %1446 = vmatpush.bf16.msra.mxu1 %v3224_v53 }
 0x5e0   : > { %1460 = vmatpush.bf16.msrb.mxu3 %v3164_v52  ;;  %v3835_v52 = vld [vmem:[%s5148_s7 + $0xdc] sm:$0xf0] }
 0x5e2   : > { %1447 = vmatpush.bf16.msra.mxu1 %v3160_v1  ;;  %v3844_v1 = vld [vmem:[%s5148_s7 + $0x12c] sm:$0xf] }
 0x5e3   : > { %v3184_v7 = vor.u32 %v3844_v1, %v3181_v2  ;;  %v3133_v1 = vld [vmem:[%s5148_s7 + $0xf8] sm:$0xf0] }
 0x5e4   : > { %1461 = vmatpush.bf16.msrb.mxu3 %v3100_v18  ;;  %v3819_v18 = vld [vmem:[%s5148_s7 + $0x5c] sm:$0xf0] }
 0x5e6   : > { %1448 = vmatpush.bf16.msra.mxu1 %v3096_v17  ;;  %v3043_v17 = vld [vmem:[%s5148_s7 + $0x20] sm:$0xf] }
 0x5e7   : > { %v3044_v28 = vor.u32 %v3819_v18, %v3043_v17  ;;  %v3878_v18 = vld [vmem:[%s5150_s9 + $0x38] sm:$0xff] }
 0x5e8   : > { %1462 = vmatpush.bf16.msrb.mxu3 %v3036_v32  ;;  %v3052_v32 = vor.u32 %v3820_v25, %v3051_v24  ;;  %v3885_v24 = vld [vmem:[%s5150_s9 + $0x70] sm:$0xff] }
 0x5e9   : > { %v3893_v25 = vld [vmem:[%s5150_s9 + $0xb0] sm:$0xff] }
 0x5ea   : > { %1449 = vmatpush.bf16.msra.mxu1 %v3032_v31  ;;  %v3869_v31 = vld [vmem:[%s5148_s7 + $0x1ec] sm:$0xf0] }
 0x64e   : > { %v918_v56 = vpop.xlane.xlu1 %917 }
 0x64f   : > { %v926_v57 = vmul.f32 %v4270_v55, %v918_v56  ;;  %v3858_v56 = vld [vmem:[%s5148_s7 + $0x19c] sm:$0xf] }
 0x651   : > { %v4273_v58 = vsub.f32 %v913_v46, %v926_v57  ;;  %v3865_v46 = vld [vmem:[%s5148_s7 + $0x1cc] sm:$0xf0]  ;;  %v3229_v57 = vld [vmem:[%s5148_s7 + $0x1d8] sm:$0xf0] }
 0x652   : > { %v3220_v48 = vor.u32 %v3865_v46, %v3219_v45  ;;  %v3232_v60 = vor.u32 %v3858_v56, %v3229_v57  ;;  %v3235_v45 = vld [vmem:[%s5148_s7 + $0x1a0] sm:$0xf] }
 0x653   : > { %v928_v12 = vmul.f32 %v4273_v58, %v4273_v58  ;;  %v3867_v46 = vld [vmem:[%s5148_s7 + $0x1dc] sm:$0xf0] }
 0x654   : > { %1433 = vmatpush.bf16.msra.mxu0 %v3220_v48  ;;  %1472 = vmatpush.bf16.msrb.mxu2 %v3232_v60  ;;  %v3237_v48 = vld [vmem:[%s5148_s7 + $0x1e0] sm:$0xf0]  ;;  %v3236_v54 = vor.u32 %v3867_v46, %v3235_v45  ;;  %v3171_v57 = vld [vmem:[%s5148_s7 + $0x120] sm:$0xf]  ;;  %v3845_v46 = vld [vmem:[%s5148_s7 + $0x134] sm:$0xf] }
 0x655   : > { %v929_v59 = vsel %vm493_vm0, %v928_v12, 0.0  ;;  %v3155_v12 = vld [vmem:[%s5148_s7 + $0x110] sm:$0xf]  ;;  %v3240_v56 = vor.u32 %v3859_v47, %v3237_v48  ;;  %v3189_v47 = vld [vmem:[%s5148_s7 + $0x170] sm:$0xf0] }
 0x656   : > { %930 = vadd.xlane.f32.xlu0 %v929_v59  ;;  %v3156_v0 = vor.u32 %v3849_v61, %v3155_v12  ;;  %v3851_v12 = vld [vmem:[%s5148_s7 + $0x15c] sm:$0xf0]  ;;  %v3843_v61 = vld [vmem:[%s5148_s7 + $0x124] sm:$0xf]  ;;  %v3195_v48 = vld [vmem:[%s5148_s7 + $0x138] sm:$0xf] }
 0x657   : > { %v3172_v3 = vor.u32 %v3851_v12, %v3171_v57  ;;  %v3176_v4 = vor.u32 %v3843_v61, %v3173_v62  ;;  %v3837_v57 = vld [vmem:[%s5148_s7 + $0xec] sm:$0xf0]  ;;  %v3125_v61 = vld [vmem:[%s5148_s7 + $0xf0] sm:$0xf0]  ;;  %v3131_v62 = vld [vmem:[%s5148_s7 + $0xb8] sm:$0xf] }
 0x658   : > { %1434 = vmatpush.bf16.msra.mxu0 %v3156_v0  ;;  %1473 = vmatpush.bf16.msrb.mxu2 %v3168_v8  ;;  %v3852_v0 = vld [vmem:[%s5148_s7 + $0x164] sm:$0xf0]  ;;  %v3827_v8 = vld [vmem:[%s5148_s7 + $0xa4] sm:$0xf] }
 0x659   : > { %v3180_v6 = vor.u32 %v3852_v0, %v3179_v63  ;;  %v3112_v16 = vor.u32 %v3827_v8, %v3109_v9  ;;  %v3838_v63 = vld [vmem:[%s5148_s7 + $0xf4] sm:$0xf0]  ;;  %v3830_v0 = vld [vmem:[%s5148_s7 + $0xbc] sm:$0xf]  ;;  %v3061_v8 = vld [vmem:[%s5148_s7 + $0x70] sm:$0xf0] }
 0x65a   : > { %v3067_v9 = vld [vmem:[%s5148_s7 + $0x38] sm:$0xf] }
 0x65c   : > { %1435 = vmatpush.bf16.msra.mxu0 %v3092_v13  ;;  %1474 = vmatpush.bf16.msrb.mxu2 %v3104_v23  ;;  %v3828_v13 = vld [vmem:[%s5148_s7 + $0xac] sm:$0xf]  ;;  %v3045_v23 = vld [vmem:[%s5148_s7 + $0x60] sm:$0xf0] }
 0x65d   : > { %v3120_v21 = vor.u32 %v3828_v13, %v3117_v14  ;;  %v3048_v29 = vor.u32 %v3811_v22, %v3045_v23  ;;  %v3069_v13 = vld [vmem:[%s5148_s7 + $0x78] sm:$0xf0]  ;;  %v3877_v23 = vld [vmem:[%s5150_s9 + $0x30] sm:$0xff] }
 0x65e   : > { %v3072_v17 = vor.u32 %v3814_v11, %v3069_v13  ;;  %v3902_v22 = vld [vmem:[%s5150_s9 + $0xf8] sm:$0xff]  ;;  %v3921_v11 = vld [vmem:[%s5150_s9 + $0x190] sm:$0xff] }
 0x65f   : > { %v3929_v13 = vld [vmem:[%s5150_s9 + $0x1d0] sm:$0xff] }
 0x660   : > { %1436 = vmatpush.bf16.msra.mxu0 %v3028_v30  ;;  %1475 = vmatpush.bf16.msrb.mxu2 %v3040_v34  ;;  %v3251_v30 = vld [vmem:[%s5148_s7 + $0x1b0] sm:$0xf]  ;;  %v3861_v34 = vld [vmem:[%s5148_s7 + $0x1b4] sm:$0xf] }
 0x6c9   : > { %v931_v20 = vpop.xlane.xlu0 %930 }
 0x6ca   : > { %v932_v59 = vmul.f32 %v931_v20, %v4270_v55  ;;  %v3245_v20 = vld [vmem:[%s5148_s7 + $0x1e8] sm:$0xf0] }
 0x6cb   : > { %v3248_v60 = vor.u32 %v3860_v51, %v3245_v20  ;;  %v3197_v51 = vld [vmem:[%s5148_s7 + $0x178] sm:$0xf0] }
 0x6cc   : > { %v933_v5 = vadd.f32 1e-05, %v932_v59 }
 0x6ce   : > { %4039 = vrsqrt.f32 %v933_v5  ;;  %vm940_vm3 = vweird.f32 %v933_v5 }
 0x6d4   : > { %v4040_v33 = vpop.eup %4039 }
 0x6d5   : > { %v935_v35 = vmul.f32 %v4040_v33, %v933_v5  ;;  %vm941_vm2 = vweird.f32 %v4040_v33  ;;  %v3107_v5 = vld [vmem:[%s5148_s7 + $0xa0] sm:$0xf] }
 0x6d6   : > { %vm942_vm8 = vmor %vm940_vm3, %vm941_vm2  ;;  %v3108_v15 = vor.u32 %v3835_v52, %v3107_v5  ;;  %v3821_v5 = vld [vmem:[%s5148_s7 + $0x6c] sm:$0xf0]  ;;  %v3132_v52 = vor.u32 %v3838_v63, %v3131_v62  ;;  %v3924_v62 = vld [vmem:[%s5150_s9 + $0x1a8] sm:$0xff] }
 0x6d7   : > { %v936_v36 = vmul.f32 %v4040_v33, %v935_v35  ;;  %v3253_v35 = vld [vmem:[%s5148_s7 + $0x1f0] sm:$0xf0]  ;;  %v3932_v63 = vld [vmem:[%s5150_s9 + $0x1e8] sm:$0xff] }
 0x6d9   : > { %v937_v37 = vmul.f32 0.5, %v936_v36  ;;  %v3259_v36 = vld [vmem:[%s5148_s7 + $0x1b8] sm:$0xf] }
 0x6db   : > { %v938_v38 = vsub.f32 1.5, %v937_v37  ;;  %v3870_v37 = vld [vmem:[%s5148_s7 + $0x1f4] sm:$0xf0] }
 0x6dd   : > { %v939_v39 = vmul.f32 %v4040_v33, %v938_v38  ;;  %v3862_v38 = vld [vmem:[%s5148_s7 + $0x1bc] sm:$0xf] }
 0x6df   : > { %v943_v41 = vsel %vm942_vm8, %v4040_v33, %v939_v39  ;;  %v3056_v33 = vor.u32 %v3812_v26, %v3053_v27  ;;  %v3261_v39 = vld [vmem:[%s5148_s7 + $0x1f8] sm:$0xf0]  ;;  %v3901_v26 = vld [vmem:[%s5150_s9 + $0xf0] sm:$0xff]  ;;  %v3876_v27 = vld [vmem:[%s5150_s9 + $0x28] sm:$0xff] }
 0x6e0   : > { %v944_v43 = vmul.f32 %v943_v41, %v4273_v58  ;;  %v3243_v58 = vld [vmem:[%s5148_s7 + $0x1a8] sm:$0xf]  ;;  %v3256_v41 = vor.u32 %v3861_v34, %v3253_v35  ;;  %v3264_v45 = vor.u32 %v3862_v38, %v3261_v39  ;;  %v3899_v34 = vld [vmem:[%s5150_s9 + $0xe0] sm:$0xff]  ;;  %v3874_v35 = vld [vmem:[%s5150_s9 + $0x18] sm:$0xff] }
 0x6e1   : > { %v3244_v59 = vor.u32 %v3868_v50, %v3243_v58  ;;  %v3854_v58 = vld [vmem:[%s5148_s7 + $0x174] sm:$0xf0]  ;;  %v3846_v50 = vld [vmem:[%s5148_s7 + $0x13c] sm:$0xf]  ;;  %v3873_v39 = vld [vmem:[%s5150_s9 + $0x10] sm:$0xff] }
 0x6e2   : > { %v948_v44 = vmul.f32 %v4016_v40, %v944_v43  ;;  %v3252_v40 = vor.u32 %v3869_v31, %v3251_v30  ;;  %v3853_v43 = vld [vmem:[%s5148_s7 + $0x16c] sm:$0xf0]  ;;  %v3196_v12 = vor.u32 %v3854_v58, %v3195_v48  ;;  %v3900_v30 = vld [vmem:[%s5150_s9 + $0xe8] sm:$0xff]  ;;  %v3875_v31 = vld [vmem:[%s5150_s9 + $0x20] sm:$0xff] }
 0x6e3   : > { %v3898_v38 = vld [vmem:[%s5150_s9 + $0xd8] sm:$0xff] }
 0x6e4   : > { %v4493_v49 = vadd.f32 %v4017_v42, %v948_v44  ;;  %v3187_v42 = vld [vmem:[%s5148_s7 + $0x130] sm:$0xf]  ;;  %v3260_v44 = vor.u32 %v3870_v37, %v3259_v36  ;;  %v3882_v36 = vld [vmem:[%s5150_s9 + $0x58] sm:$0xff] }
 0x6e5   : > { %v3188_v20 = vor.u32 %v3853_v43, %v3187_v42  ;;  %v3890_v37 = vld [vmem:[%s5150_s9 + $0x98] sm:$0xff]  ;;  %v3872_v42 = vld [vmem:[%s5150_s9 + $0x8] sm:$0xff] }
 0x6e6   : > { %v4506_v53 = vpack.c.bf16 %v4493_v49, %v4493_v49  ;;  %v3880_v43 = vld [vmem:[%s5150_s9 + $0x48] sm:$0xff]  ;;  %v3910_v48 = vld [vmem:[%s5150_s9 + $0x138] sm:$0xff] }
 0x6e7   : > { %v3918_v58 = vld [vmem:[%s5150_s9 + $0x178] sm:$0xff] }
 0x6e8   : > { %3265 = vmatmul.msk.bf16.vlgmr.msrb.gmra.mxu0 %vm493_vm0, %v4506_v53  ;;  %3266 = vmatmul.msk.bf16.vlgmr.msrb.gmra.mxu1 %vm493_vm0, %v4506_v53 }
 0x6e9   : > { %3267 = vmatmul.msk.bf16.vlgmr.msra.gmra.mxu3 %vm493_vm0, %v4506_v53  ;;  %3268 = vmatmul.msk.bf16.vlgmr.msra.gmra.mxu2 %vm493_vm0, %v4506_v53 }
 0x6ea   : > { %1485 = vmatpush.bf16.msrb.mxu0 %v3236_v54  ;;  %1498 = vmatpush.bf16.msrb.mxu1 %v3240_v56  ;;  %v3192_v54 = vor.u32 %v3845_v46, %v3189_v47  ;;  %v3123_v56 = vld [vmem:[%s5148_s7 + $0xb0] sm:$0xf]  ;;  %v3871_v46 = vld [vmem:[%s5150_s9] sm:$0xff] }
 0x6eb   : > { %1511 = vmatpush.bf16.msra.mxu3 %v3244_v59  ;;  %1524 = vmatpush.bf16.msra.mxu2 %v3248_v60  ;;  %v3200_v59 = vor.u32 %v3846_v50, %v3197_v51  ;;  %v3829_v60 = vld [vmem:[%s5148_s7 + $0xb4] sm:$0xf]  ;;  %v3124_v2 = vor.u32 %v3837_v57, %v3123_v56  ;;  %v3879_v47 = vld [vmem:[%s5150_s9 + $0x40] sm:$0xff] }
 0x6ec   : > { %v3887_v50 = vld [vmem:[%s5150_s9 + $0x80] sm:$0xff]  ;;  %v3909_v56 = vld [vmem:[%s5150_s9 + $0x130] sm:$0xff] }
 0x6ed   : > { %v3895_v51 = vld [vmem:[%s5150_s9 + $0xc0] sm:$0xff]  ;;  %v3917_v57 = vld [vmem:[%s5150_s9 + $0x170] sm:$0xff] }
 0x6ee   : > { %1486 = vmatpush.bf16.msrb.mxu0 %v3172_v3  ;;  %1499 = vmatpush.bf16.msrb.mxu1 %v3176_v4  ;;  %v3128_v3 = vor.u32 %v3829_v60, %v3125_v61  ;;  %v3059_v4 = vld [vmem:[%s5148_s7 + $0x30] sm:$0xf]  ;;  %v3908_v60 = vld [vmem:[%s5150_s9 + $0x128] sm:$0xff] }
 0x6ef   : > { %1512 = vmatpush.bf16.msra.mxu3 %v3180_v6  ;;  %1525 = vmatpush.bf16.msra.mxu2 %v3184_v7  ;;  %v3136_v6 = vor.u32 %v3830_v0, %v3133_v1  ;;  %v3813_v7 = vld [vmem:[%s5148_s7 + $0x34] sm:$0xf]  ;;  %v3060_v14 = vor.u32 %v3821_v5, %v3059_v4  ;;  %v3916_v61 = vld [vmem:[%s5150_s9 + $0x168] sm:$0xff]  ;;  %v3907_v0 = vld [vmem:[%s5150_s9 + $0x120] sm:$0xff] }
 0x6f0   : > { %v3915_v1 = vld [vmem:[%s5150_s9 + $0x160] sm:$0xff]  ;;  %v3906_v4 = vld [vmem:[%s5150_s9 + $0x118] sm:$0xff] }
 0x6f1   : > { %v3914_v5 = vld [vmem:[%s5150_s9 + $0x158] sm:$0xff] }
 0x6f2   : > { %1487 = vmatpush.bf16.msrb.mxu0 %v3108_v15  ;;  %1500 = vmatpush.bf16.msrb.mxu1 %v3112_v16  ;;  %v3064_v15 = vor.u32 %v3813_v7, %v3061_v8  ;;  %v3068_v16 = vor.u32 %v3822_v10, %v3067_v9  ;;  %v3922_v7 = vld [vmem:[%s5150_s9 + $0x198] sm:$0xff]  ;;  %v3904_v9 = vld [vmem:[%s5150_s9 + $0x108] sm:$0xff] }
 0x6f3   : > { %1513 = vmatpush.bf16.msra.mxu3 %v3116_v19  ;;  %1526 = vmatpush.bf16.msra.mxu2 %v3120_v21  ;;  %v3886_v19 = vld [vmem:[%s5150_s9 + $0x78] sm:$0xff]  ;;  %v3912_v10 = vld [vmem:[%s5150_s9 + $0x148] sm:$0xff] }
 0x6f4   : > { %v3894_v21 = vld [vmem:[%s5150_s9 + $0xb8] sm:$0xff] }
 0x6f5   : > { %v3930_v8 = vld [vmem:[%s5150_s9 + $0x1d8] sm:$0xff] }
 0x6f6   : > { %1488 = vmatpush.bf16.msrb.mxu0 %v3044_v28  ;;  %1501 = vmatpush.bf16.msrb.mxu1 %v3048_v29  ;;  %v3884_v28 = vld [vmem:[%s5150_s9 + $0x68] sm:$0xff] }
 0x6f7   : > { %1514 = vmatpush.bf16.msra.mxu3 %v3052_v32  ;;  %1527 = vmatpush.bf16.msra.mxu2 %v3056_v33  ;;  %v3892_v29 = vld [vmem:[%s5150_s9 + $0xa8] sm:$0xff]  ;;  %v3883_v32 = vld [vmem:[%s5150_s9 + $0x60] sm:$0xff] }
 0x6f8   : > { %3269 = vmatmul.msk.bf16.vlgmr.msra.gmra.mxu0 %vm493_vm0, %v4506_v53  ;;  %3270 = vmatmul.msk.bf16.vlgmr.msra.gmra.mxu1 %vm493_vm0, %v4506_v53  ;;  %v3891_v33 = vld [vmem:[%s5150_s9 + $0xa0] sm:$0xff] }
 0x6f9   : > { %3271 = vmatmul.msk.bf16.vlgmr.msrb.gmra.mxu3 %vm493_vm0, %v4506_v53  ;;  %3272 = vmatmul.msk.bf16.vlgmr.msrb.gmra.mxu2 %vm493_vm0, %v4506_v53 }
 0x6fa   : > { %1537 = vmatpush.bf16.msra.mxu0 %v3252_v40  ;;  %1550 = vmatpush.bf16.msra.mxu1 %v3256_v41  ;;  %v3881_v40 = vld [vmem:[%s5150_s9 + $0x50] sm:$0xff] }
 0x6fb   : > { %1563 = vmatpush.bf16.msrb.mxu3 %v3260_v44  ;;  %1576 = vmatpush.bf16.msrb.mxu2 %v3264_v45  ;;  %v3889_v41 = vld [vmem:[%s5150_s9 + $0x90] sm:$0xff]  ;;  %v3888_v44 = vld [vmem:[%s5150_s9 + $0x88] sm:$0xff] }
 0x6fc   : > { %v3896_v45 = vld [vmem:[%s5150_s9 + $0xc8] sm:$0xff] }
 0x6fe   : > { %1538 = vmatpush.bf16.msra.mxu0 %v3188_v20  ;;  %1551 = vmatpush.bf16.msra.mxu1 %v3192_v54  ;;  %v3926_v20 = vld [vmem:[%s5150_s9 + $0x1b8] sm:$0xff] }
 0x6ff   : > { %1564 = vmatpush.bf16.msrb.mxu3 %v3196_v12  ;;  %1577 = vmatpush.bf16.msrb.mxu2 %v3200_v59  ;;  %v3934_v54 = vld [vmem:[%s5150_s9 + $0x1f8] sm:$0xff]  ;;  %v3925_v12 = vld [vmem:[%s5150_s9 + $0x1b0] sm:$0xff] }
 0x700   : > { %v3933_v59 = vld [vmem:[%s5150_s9 + $0x1f0] sm:$0xff] }
 0x702   : > { %1539 = vmatpush.bf16.msra.mxu0 %v3124_v2  ;;  %1552 = vmatpush.bf16.msra.mxu1 %v3128_v3  ;;  %v3923_v2 = vld [vmem:[%s5150_s9 + $0x1a0] sm:$0xff] }
 0x703   : > { %1565 = vmatpush.bf16.msrb.mxu3 %v3132_v52  ;;  %1578 = vmatpush.bf16.msrb.mxu2 %v3136_v6  ;;  %v3931_v3 = vld [vmem:[%s5150_s9 + $0x1e0] sm:$0xff]  ;;  %v3905_v52 = vld [vmem:[%s5150_s9 + $0x110] sm:$0xff] }
 0x704   : > { %v3913_v6 = vld [vmem:[%s5150_s9 + $0x150] sm:$0xff] }
 0x706   : > { %1540 = vmatpush.bf16.msra.mxu0 %v3060_v14  ;;  %1553 = vmatpush.bf16.msra.mxu1 %v3064_v15  ;;  %v3903_v14 = vld [vmem:[%s5150_s9 + $0x100] sm:$0xff] }
 0x707   : > { %1566 = vmatpush.bf16.msrb.mxu3 %v3068_v16  ;;  %1579 = vmatpush.bf16.msrb.mxu2 %v3072_v17  ;;  %v3911_v15 = vld [vmem:[%s5150_s9 + $0x140] sm:$0xff]  ;;  %v3920_v16 = vld [vmem:[%s5150_s9 + $0x188] sm:$0xff] }
 0x708   : > { %3273 = vmatmul.msk.bf16.vlgmr.msrb.gmra.mxu0 %vm493_vm0, %v4506_v53  ;;  %3274 = vmatmul.msk.bf16.vlgmr.msrb.gmra.mxu1 %vm493_vm0, %v4506_v53  ;;  %v3928_v17 = vld [vmem:[%s5150_s9 + $0x1c8] sm:$0xff] }
 0x709   : > { %3275 = vmatmul.msk.bf16.vlgmr.msra.gmra.mxu3 %vm493_vm0, %v4506_v53  ;;  %3276 = vmatmul.msk.bf16.vlgmr.msra.gmra.mxu2 %vm493_vm0, %v4506_v53 }
 0x70a   : > { %2645 = vmatpush.bf16.msrb.mxu0 %v3878_v18  ;;  %2658 = vmatpush.bf16.msrb.mxu1 %v3886_v19  ;;  %v3919_v18 = vld [vmem:[%s5150_s9 + $0x180] sm:$0xff] }
 0x70b   : > { %2671 = vmatpush.bf16.msra.mxu3 %v3894_v21  ;;  %2684 = vmatpush.bf16.msra.mxu2 %v3902_v22  ;;  %v3927_v19 = vld [vmem:[%s5150_s9 + $0x1c0] sm:$0xff] }
 0x70c   : > { %v4903_v21 = vld [vmem:[%s5149_s8] sm:$0xff] }
 0x70d   : > { %v1022_v22 = vperm.slane %v4903_v21, 0 }
 0x70e   : > { %2646 = vmatpush.bf16.msrb.mxu0 %v3877_v23  ;;  %2659 = vmatpush.bf16.msrb.mxu1 %v3885_v24  ;;  %v1023_v23 = vperm.slane %v4903_v21, 1 }
 0x70f   : > { %2672 = vmatpush.bf16.msra.mxu3 %v3893_v25  ;;  %2685 = vmatpush.bf16.msra.mxu2 %v3901_v26 }
 0x712   : > { %2647 = vmatpush.bf16.msrb.mxu0 %v3876_v27  ;;  %2660 = vmatpush.bf16.msrb.mxu1 %v3884_v28 }
 0x713   : > { %2673 = vmatpush.bf16.msra.mxu3 %v3892_v29  ;;  %2686 = vmatpush.bf16.msra.mxu2 %v3900_v30  ;;  %v1024_v30 = vperm.slane %v4903_v21, 2 }
 0x716   : > { %2648 = vmatpush.bf16.msrb.mxu0 %v3875_v31  ;;  %2661 = vmatpush.bf16.msrb.mxu1 %v3883_v32  ;;  %v1025_v31 = vperm.slane %v4903_v21, 3  ;;  %v3942_v32 = vld [vmem:[%s5150_s9 + $0x238] sm:$0xff] }
 0x717   : > { %2674 = vmatpush.bf16.msra.mxu3 %v3891_v33  ;;  %2687 = vmatpush.bf16.msra.mxu2 %v3899_v34  ;;  %v3950_v33 = vld [vmem:[%s5150_s9 + $0x278] sm:$0xff] }
 0x718   : > { %3277 = vmatmul.msk.bf16.vlgmr.msra.gmra.mxu0 %vm493_vm0, %v4506_v53  ;;  %3278 = vmatmul.msk.bf16.vlgmr.msra.gmra.mxu1 %vm493_vm0, %v4506_v53 }
 0x719   : > { %3279 = vmatmul.msk.bf16.vlgmr.msrb.gmra.mxu3 %vm493_vm0, %v4506_v53  ;;  %3280 = vmatmul.msk.bf16.vlgmr.msrb.gmra.mxu2 %vm493_vm0, %v4506_v53  ;;  %v3897_v53 = vld [vmem:[%s5150_s9 + $0xd0] sm:$0xff] }
 0x71a   : > { %2649 = vmatpush.bf16.msrb.mxu0 %v3874_v35  ;;  %2662 = vmatpush.bf16.msrb.mxu1 %v3882_v36 }
 0x71b   : > { %2675 = vmatpush.bf16.msra.mxu3 %v3890_v37  ;;  %2688 = vmatpush.bf16.msra.mxu2 %v3898_v38 }
 0x71e   : > { %2650 = vmatpush.bf16.msrb.mxu0 %v3873_v39  ;;  %2663 = vmatpush.bf16.msrb.mxu1 %v3881_v40 }
 0x71f   : > { %2676 = vmatpush.bf16.msra.mxu3 %v3889_v41  ;;  %2689 = vmatpush.bf16.msra.mxu2 %v3897_v53  ;;  %v3941_v53 = vld [vmem:[%s5150_s9 + $0x230] sm:$0xff] }
 0x722   : > { %2651 = vmatpush.bf16.msrb.mxu0 %v3872_v42  ;;  %2664 = vmatpush.bf16.msrb.mxu1 %v3880_v43  ;;  %v3949_v42 = vld [vmem:[%s5150_s9 + $0x270] sm:$0xff] }
 0x723   : > { %2677 = vmatpush.bf16.msra.mxu3 %v3888_v44  ;;  %2690 = vmatpush.bf16.msra.mxu2 %v3896_v45  ;;  %v3958_v45 = vld [vmem:[%s5150_s9 + $0x2b8] sm:$0xff] }
 0x726   : > { %2652 = vmatpush.bf16.msrb.mxu0 %v3871_v46  ;;  %2665 = vmatpush.bf16.msrb.mxu1 %v3879_v47  ;;  %v3966_v46 = vld [vmem:[%s5150_s9 + $0x2f8] sm:$0xff] }
 0x727   : > { %2678 = vmatpush.bf16.msra.mxu3 %v3887_v50  ;;  %2691 = vmatpush.bf16.msra.mxu2 %v3895_v51  ;;  %v3948_v50 = vld [vmem:[%s5150_s9 + $0x268] sm:$0xff]  ;;  %v1026_v51 = vperm.slane %v4903_v21, 4 }
 0x72a   : > { %2697 = vmatpush.bf16.msra.mxu0 %v3910_v48  ;;  %2710 = vmatpush.bf16.msra.mxu1 %v3918_v58  ;;  %v3940_v58 = vld [vmem:[%s5150_s9 + $0x228] sm:$0xff] }
 0x72b   : > { %2723 = vmatpush.bf16.msrb.mxu3 %v3926_v20  ;;  %2736 = vmatpush.bf16.msrb.mxu2 %v3934_v54  ;;  %v1027_v20 = vperm.slane %v4903_v21, 5 }
 0x72e   : > { %2698 = vmatpush.bf16.msra.mxu0 %v3909_v56  ;;  %2711 = vmatpush.bf16.msra.mxu1 %v3917_v57  ;;  %v3957_v57 = vld [vmem:[%s5150_s9 + $0x2b0] sm:$0xff] }
 0x72f   : > { %2724 = vmatpush.bf16.msrb.mxu3 %v3925_v12  ;;  %2737 = vmatpush.bf16.msrb.mxu2 %v3933_v59  ;;  %v3965_v12 = vld [vmem:[%s5150_s9 + $0x2f0] sm:$0xff] }
 0x732   : > { %2699 = vmatpush.bf16.msra.mxu0 %v3908_v60  ;;  %2712 = vmatpush.bf16.msra.mxu1 %v3916_v61  ;;  %v3939_v61 = vld [vmem:[%s5150_s9 + $0x220] sm:$0xff] }
 0x733   : > { %2725 = vmatpush.bf16.msrb.mxu3 %v3924_v62  ;;  %2738 = vmatpush.bf16.msrb.mxu2 %v3932_v63  ;;  %v3947_v62 = vld [vmem:[%s5150_s9 + $0x260] sm:$0xff] }
 0x736   : > { %2700 = vmatpush.bf16.msra.mxu0 %v3907_v0  ;;  %2713 = vmatpush.bf16.msra.mxu1 %v3915_v1 }
 0x737   : > { %2726 = vmatpush.bf16.msrb.mxu3 %v3923_v2  ;;  %2739 = vmatpush.bf16.msrb.mxu2 %v3931_v3  ;;  %v3956_v3 = vld [vmem:[%s5150_s9 + $0x2a8] sm:$0xff] }
 0x73a   : > { %2701 = vmatpush.bf16.msra.mxu0 %v3906_v4  ;;  %2714 = vmatpush.bf16.msra.mxu1 %v3914_v5  ;;  %v3964_v4 = vld [vmem:[%s5150_s9 + $0x2e8] sm:$0xff]  ;;  %v1028_v5 = vperm.slane %v4903_v21, 6 }
 0x73b   : > { %2727 = vmatpush.bf16.msrb.mxu3 %v3922_v7  ;;  %2740 = vmatpush.bf16.msrb.mxu2 %v3930_v8  ;;  %v3938_v8 = vld [vmem:[%s5150_s9 + $0x218] sm:$0xff] }
 0x73e   : > { %2702 = vmatpush.bf16.msra.mxu0 %v3905_v52  ;;  %2715 = vmatpush.bf16.msra.mxu1 %v3913_v6  ;;  %v1029_v52 = vperm.slane %v4903_v21, 7  ;;  %v3945_v21 = vld [vmem:[%s5150_s9 + $0x250] sm:$0xff] }
 0x73f   : > { %2728 = vmatpush.bf16.msrb.mxu3 %v3921_v11  ;;  %2741 = vmatpush.bf16.msrb.mxu2 %v3929_v13  ;;  %v3955_v13 = vld [vmem:[%s5150_s9 + $0x2a0] sm:$0xff] }
 0x742   : > { %2703 = vmatpush.bf16.msra.mxu0 %v3904_v9  ;;  %2716 = vmatpush.bf16.msra.mxu1 %v3912_v10  ;;  %v3946_v9 = vld [vmem:[%s5150_s9 + $0x258] sm:$0xff] }
 0x743   : > { %2729 = vmatpush.bf16.msrb.mxu3 %v3920_v16  ;;  %2742 = vmatpush.bf16.msrb.mxu2 %v3928_v17 }
 0x746   : > { %2704 = vmatpush.bf16.msra.mxu0 %v3903_v14  ;;  %2717 = vmatpush.bf16.msra.mxu1 %v3911_v15  ;;  %v3963_v14 = vld [vmem:[%s5150_s9 + $0x2e0] sm:$0xff] }
 0x747   : > { %2730 = vmatpush.bf16.msrb.mxu3 %v3919_v18  ;;  %2743 = vmatpush.bf16.msrb.mxu2 %v3927_v19  ;;  %v3937_v19 = vld [vmem:[%s5150_s9 + $0x210] sm:$0xff] }
 0x765   : > { %v1386_v24 = vpop.f32.mrf.mxu0  ;;  %v1399_v25 = vpop.f32.mrf.mxu1 }
 0x766   : > { %v1387_v26 = vadd.f32 %v1386_v24, %v1022_v22  ;;  %v1400_v27 = vadd.f32 %v1399_v25, %v1023_v23  ;;  %v4976_v24 = vld [vmem:[%s5149_s8 + $0x8] sm:$0xff]  ;;  %v3954_v25 = vld [vmem:[%s5150_s9 + $0x298] sm:$0xff] }
 0x768   : > { %v1585_v28 = vmax.f32 %v1387_v26, 0.0  ;;  %v1586_v29 = vmax.f32 %v1400_v27, 0.0  ;;  %v3962_v26 = vld [vmem:[%s5150_s9 + $0x2d8] sm:$0xff] }
 0x76a   : > { %v1601_v34 = vpack.c.bf16 %v1585_v28, %v1585_v28  ;;  %v1602_v35 = vpack.c.bf16 %v1586_v29, %v1586_v29  ;;  %v3936_v29 = vld [vmem:[%s5150_s9 + $0x208] sm:$0xff] }
 0x76c   : > { %v1412_v36 = vpop.f32.mrf.mxu3  ;;  %v1425_v37 = vpop.f32.mrf.mxu2  ;;  %2653 = vmatmul.bf16.vlgmr.msrb.gmra.mxu0 %v1601_v34  ;;  %2666 = vmatmul.bf16.vlgmr.msrb.gmra.mxu1 %v1602_v35  ;;  %v3953_v35 = vld [vmem:[%s5150_s9 + $0x290] sm:$0xff] }
 0x76d   : > { %v1413_v38 = vadd.f32 %v1412_v36, %v1024_v30  ;;  %v1426_v39 = vadd.f32 %v1425_v37, %v1025_v31  ;;  %2749 = vmatpush.bf16.msrb.mxu0 %v3942_v32  ;;  %2762 = vmatpush.bf16.msrb.mxu1 %v3950_v33  ;;  %v1388_v40 = vpop.f32.mrf.mxu0  ;;  %v1401_v41 = vpop.f32.mrf.mxu1  ;;  %v3944_v30 = vld [vmem:[%s5150_s9 + $0x248] sm:$0xff]  ;;  %v1030_v31 = vperm.slane %v4976_v24, 0  ;;  %v1031_v32 = vperm.slane %v4976_v24, 1  ;;  %v3961_v36 = vld [vmem:[%s5150_s9 + $0x2d0] sm:$0xff] }
 0x76e   : > { %v3935_v41 = vld [vmem:[%s5150_s9 + $0x200] sm:$0xff] }
 0x76f   : > { %v1587_v43 = vmax.f32 %v1413_v38, 0.0  ;;  %v1588_v44 = vmax.f32 %v1426_v39, 0.0 }
 0x771   : > { %v1603_v47 = vpack.c.bf16 %v1587_v43, %v1587_v43  ;;  %v1604_v48 = vpack.c.bf16 %v1588_v44, %v1588_v44  ;;  %2750 = vmatpush.bf16.msrb.mxu0 %v3941_v53  ;;  %2763 = vmatpush.bf16.msrb.mxu1 %v3949_v42  ;;  %v3943_v53 = vld [vmem:[%s5150_s9 + $0x240] sm:$0xff]  ;;  %v3974_v42 = vld [vmem:[%s5150_s9 + $0x338] sm:$0xff] }
 0x772   : > { %v3982_v43 = vld [vmem:[%s5150_s9 + $0x378] sm:$0xff] }
 0x773   : > { %2679 = vmatmul.bf16.vlgmr.msra.gmra.mxu3 %v1603_v47  ;;  %2692 = vmatmul.bf16.vlgmr.msra.gmra.mxu2 %v1604_v48  ;;  %v3960_v47 = vld [vmem:[%s5150_s9 + $0x2c8] sm:$0xff]  ;;  %v1032_v48 = vperm.slane %v4976_v24, 2 }
 0x774   : > { %2775 = vmatpush.bf16.msra.mxu3 %v3958_v45  ;;  %2788 = vmatpush.bf16.msra.mxu2 %v3966_v46  ;;  %v1414_v54 = vpop.f32.mrf.mxu3  ;;  %v1427_v56 = vpop.f32.mrf.mxu2  ;;  %v3952_v46 = vld [vmem:[%s5150_s9 + $0x288] sm:$0xff] }
 0x775   : > { %2751 = vmatpush.bf16.msrb.mxu0 %v3940_v58  ;;  %2764 = vmatpush.bf16.msrb.mxu1 %v3948_v50  ;;  %v1438_v59 = vpop.f32.mrf.mxu0  ;;  %v1451_v60 = vpop.f32.mrf.mxu1  ;;  %v1033_v58 = vperm.slane %v4976_v24, 3  ;;  %v3981_v54 = vld [vmem:[%s5150_s9 + $0x370] sm:$0xff] }
 0x776   : > { %v1439_v63 = vadd.f32 %v1438_v59, %v1026_v51  ;;  %v1452_v0 = vadd.f32 %v1451_v60, %v1027_v20  ;;  %v3973_v20 = vld [vmem:[%s5150_s9 + $0x330] sm:$0xff]  ;;  %v3959_v59 = vld [vmem:[%s5150_s9 + $0x2c0] sm:$0xff] }
 0x778   : > { %v1589_v1 = vmax.f32 %v1439_v63, 0.0  ;;  %v1590_v2 = vmax.f32 %v1452_v0, 0.0  ;;  %2776 = vmatpush.bf16.msra.mxu3 %v3957_v57  ;;  %2789 = vmatpush.bf16.msra.mxu2 %v3965_v12  ;;  %v3951_v12 = vld [vmem:[%s5150_s9 + $0x280] sm:$0xff]  ;;  %v3990_v0 = vld [vmem:[%s5150_s9 + $0x3b8] sm:$0xff] }
 0x779   : > { %2752 = vmatpush.bf16.msrb.mxu0 %v3939_v61  ;;  %2765 = vmatpush.bf16.msrb.mxu1 %v3947_v62 }
 0x77a   : > { %v1605_v6 = vpack.c.bf16 %v1589_v1, %v1589_v1  ;;  %v1606_v7 = vpack.c.bf16 %v1590_v2, %v1590_v2  ;;  %v3998_v1 = vld [vmem:[%s5150_s9 + $0x3f8] sm:$0xff] }
 0x77c   : > { %2777 = vmatpush.bf16.msra.mxu3 %v3956_v3  ;;  %2790 = vmatpush.bf16.msra.mxu2 %v3964_v4  ;;  %v1464_v10 = vpop.f32.mrf.mxu3  ;;  %v1477_v11 = vpop.f32.mrf.mxu2  ;;  %v3972_v4 = vld [vmem:[%s5150_s9 + $0x328] sm:$0xff] }
 0x77d   : > { %v1465_v15 = vadd.f32 %v1464_v10, %v1028_v5  ;;  %v1478_v16 = vadd.f32 %v1477_v11, %v1029_v52  ;;  %2705 = vmatmul.bf16.vlgmr.msra.gmra.mxu0 %v1605_v6  ;;  %2718 = vmatmul.bf16.vlgmr.msra.gmra.mxu1 %v1606_v7  ;;  %v1440_v17 = vpop.f32.mrf.mxu0  ;;  %v1453_v18 = vpop.f32.mrf.mxu1  ;;  %v3980_v5 = vld [vmem:[%s5150_s9 + $0x368] sm:$0xff]  ;;  %v3989_v7 = vld [vmem:[%s5150_s9 + $0x3b0] sm:$0xff]  ;;  %v3979_v10 = vld [vmem:[%s5150_s9 + $0x360] sm:$0xff] }
 0x77e   : > { %2753 = vmatpush.bf16.msrb.mxu0 %v3938_v8  ;;  %2766 = vmatpush.bf16.msrb.mxu1 %v3946_v9  ;;  %v3997_v8 = vld [vmem:[%s5150_s9 + $0x3f0] sm:$0xff]  ;;  %v3971_v9 = vld [vmem:[%s5150_s9 + $0x320] sm:$0xff]  ;;  %v3996_v17 = vld [vmem:[%s5150_s9 + $0x3e8] sm:$0xff] }
 0x77f   : > { %v1591_v22 = vmax.f32 %v1465_v15, 0.0  ;;  %v1592_v23 = vmax.f32 %v1478_v16, 0.0  ;;  %v3988_v16 = vld [vmem:[%s5150_s9 + $0x3a8] sm:$0xff]  ;;  %v3970_v18 = vld [vmem:[%s5150_s9 + $0x318] sm:$0xff] }
 0x780   : > { %2778 = vmatpush.bf16.msra.mxu3 %v3955_v13  ;;  %2791 = vmatpush.bf16.msra.mxu2 %v3963_v14 }
 0x781   : > { %v1607_v27 = vpack.c.bf16 %v1591_v22, %v1591_v22  ;;  %v1608_v28 = vpack.c.bf16 %v1592_v23, %v1592_v23  ;;  %v3995_v22 = vld [vmem:[%s5150_s9 + $0x3e0] sm:$0xff]  ;;  %v3969_v23 = vld [vmem:[%s5150_s9 + $0x310] sm:$0xff] }
 0x782   : > { %2754 = vmatpush.bf16.msrb.mxu0 %v3937_v19  ;;  %2767 = vmatpush.bf16.msrb.mxu1 %v3945_v21  ;;  %v3978_v19 = vld [vmem:[%s5150_s9 + $0x358] sm:$0xff]  ;;  %v3987_v21 = vld [vmem:[%s5150_s9 + $0x3a0] sm:$0xff] }
 0x783   : > { %2731 = vmatmul.bf16.vlgmr.msrb.gmra.mxu3 %v1607_v27  ;;  %2744 = vmatmul.bf16.vlgmr.msrb.gmra.mxu2 %v1608_v28  ;;  %v1035_v27 = vperm.slane %v4976_v24, 5 }
 0x784   : > { %2779 = vmatpush.bf16.msra.mxu3 %v3954_v25  ;;  %2792 = vmatpush.bf16.msra.mxu2 %v3962_v26  ;;  %v1466_v33 = vpop.f32.mrf.mxu3  ;;  %v1479_v34 = vpop.f32.mrf.mxu2  ;;  %v3977_v25 = vld [vmem:[%s5150_s9 + $0x350] sm:$0xff]  ;;  %v1034_v26 = vperm.slane %v4976_v24, 4 }
 0x785   : > { %v1490_v37 = vpop.f32.mrf.mxu0  ;;  %v1503_v38 = vpop.f32.mrf.mxu1  ;;  %v3994_v33 = vld [vmem:[%s5150_s9 + $0x3d8] sm:$0xff]  ;;  %v3968_v34 = vld [vmem:[%s5150_s9 + $0x308] sm:$0xff] }
 0x786   : > { %2755 = vmatpush.bf16.msrb.mxu0 %v3936_v29  ;;  %2768 = vmatpush.bf16.msrb.mxu1 %v3944_v30  ;;  %v1491_v39 = vadd.f32 %v1490_v37, %v1030_v31  ;;  %v1504_v40 = vadd.f32 %v1503_v38, %v1031_v32  ;;  %v3986_v32 = vld [vmem:[%s5150_s9 + $0x398] sm:$0xff]  ;;  %v3985_v38 = vld [vmem:[%s5150_s9 + $0x390] sm:$0xff] }
 0x788   : > { %v1593_v44 = vmax.f32 %v1491_v39, 0.0  ;;  %v1594_v45 = vmax.f32 %v1504_v40, 0.0  ;;  %2780 = vmatpush.bf16.msra.mxu3 %v3953_v35  ;;  %2793 = vmatpush.bf16.msra.mxu2 %v3961_v36  ;;  %v3976_v35 = vld [vmem:[%s5150_s9 + $0x348] sm:$0xff]  ;;  %v3993_v39 = vld [vmem:[%s5150_s9 + $0x3d0] sm:$0xff]  ;;  %v1036_v40 = vperm.slane %v4976_v24, 6 }
 0x78a   : > { %v1609_v50 = vpack.c.bf16 %v1593_v44, %v1593_v44  ;;  %v1610_v51 = vpack.c.bf16 %v1594_v45, %v1594_v45  ;;  %2756 = vmatpush.bf16.msrb.mxu0 %v3935_v41  ;;  %2769 = vmatpush.bf16.msrb.mxu1 %v3943_v53  ;;  %v1037_v41 = vperm.slane %v4976_v24, 7  ;;  %v3967_v53 = vld [vmem:[%s5150_s9 + $0x300] sm:$0xff]  ;;  %v3984_v24 = vld [vmem:[%s5150_s9 + $0x388] sm:$0xff] }
 0x78c   : > { %2781 = vmatpush.bf16.msra.mxu3 %v3952_v46  ;;  %2794 = vmatpush.bf16.msra.mxu2 %v3960_v47  ;;  %v1516_v56 = vpop.f32.mrf.mxu3  ;;  %v1529_v57 = vpop.f32.mrf.mxu2  ;;  %v3992_v47 = vld [vmem:[%s5150_s9 + $0x3c8] sm:$0xff] }
 0x78d   : > { %v1517_v60 = vadd.f32 %v1516_v56, %v1032_v48  ;;  %v1530_v61 = vadd.f32 %v1529_v57, %v1033_v58  ;;  %2757 = vmatmul.bf16.vlgmr.msrb.gmra.mxu0 %v1609_v50  ;;  %2770 = vmatmul.bf16.vlgmr.msrb.gmra.mxu1 %v1610_v51  ;;  %v1492_v62 = vpop.f32.mrf.mxu0  ;;  %v1505_v63 = vpop.f32.mrf.mxu1 }
 0x78e   : > { %2801 = vmatpush.bf16.msra.mxu0 %v3974_v42  ;;  %2814 = vmatpush.bf16.msra.mxu1 %v3982_v43  ;;  %v3975_v42 = vld [vmem:[%s5150_s9 + $0x340] sm:$0xff] }
 0x78f   : > { %v1595_v2 = vmax.f32 %v1517_v60, 0.0  ;;  %v1596_v3 = vmax.f32 %v1530_v61, 0.0 }
 0x790   : > { %2782 = vmatpush.bf16.msra.mxu3 %v3951_v12  ;;  %2795 = vmatpush.bf16.msra.mxu2 %v3959_v59 }
 0x791   : > { %v1611_v52 = vpack.c.bf16 %v1595_v2, %v1595_v2  ;;  %v1612_v6 = vpack.c.bf16 %v1596_v3, %v1596_v3 }
 0x792   : > { %2802 = vmatpush.bf16.msra.mxu0 %v3973_v20  ;;  %2815 = vmatpush.bf16.msra.mxu1 %v3981_v54  ;;  %v3983_v20 = vld [vmem:[%s5150_s9 + $0x380] sm:$0xff] }
 0x793   : > { %2783 = vmatmul.bf16.vlgmr.msra.gmra.mxu3 %v1611_v52  ;;  %2796 = vmatmul.bf16.vlgmr.msra.gmra.mxu2 %v1612_v6  ;;  %v3991_v54 = vld [vmem:[%s5150_s9 + $0x3c0] sm:$0xff] }
 0x794   : > { %2827 = vmatpush.bf16.msrb.mxu3 %v3990_v0  ;;  %2840 = vmatpush.bf16.msrb.mxu2 %v3998_v1  ;;  %v1518_v11 = vpop.f32.mrf.mxu3  ;;  %v1531_v13 = vpop.f32.mrf.mxu2  ;;  %v4018_v52 = vld [vmem:[%s5151_s10] ss:$0 sm:$0xff] }
 0x795   : > { %v1542_v14 = vpop.f32.mrf.mxu0  ;;  %v1555_v15 = vpop.f32.mrf.mxu1 }
 0x796   : > { %2803 = vmatpush.bf16.msra.mxu0 %v3972_v4  ;;  %2816 = vmatpush.bf16.msra.mxu1 %v3980_v5  ;;  %v1543_v36 = vadd.f32 %v1542_v14, %v1034_v26  ;;  %v1556_v37 = vadd.f32 %v1555_v15, %v1035_v27 }
 0x798   : > { %2828 = vmatpush.bf16.msrb.mxu3 %v3989_v7  ;;  %2841 = vmatpush.bf16.msrb.mxu2 %v3997_v8  ;;  %v1597_v43 = vmax.f32 %v1543_v36, 0.0  ;;  %v1598_v44 = vmax.f32 %v1556_v37, 0.0 }
 0x79a   : > { %2804 = vmatpush.bf16.msra.mxu0 %v3971_v9  ;;  %2817 = vmatpush.bf16.msra.mxu1 %v3979_v10  ;;  %v1613_v50 = vpack.c.bf16 %v1597_v43, %v1597_v43  ;;  %v1614_v51 = vpack.c.bf16 %v1598_v44, %v1598_v44 }
 0x79c   : > { %2829 = vmatpush.bf16.msrb.mxu3 %v3988_v16  ;;  %2842 = vmatpush.bf16.msrb.mxu2 %v3996_v17  ;;  %v1568_v28 = vpop.f32.mrf.mxu3  ;;  %v1581_v29 = vpop.f32.mrf.mxu2 }
 0x79d   : > { %v1544_v30 = vpop.f32.mrf.mxu0  ;;  %v1557_v31 = vpop.f32.mrf.mxu1  ;;  %v1569_v48 = vadd.f32 %v1568_v28, %v1036_v40  ;;  %v1582_v58 = vadd.f32 %v1581_v29, %v1037_v41 }
 0x79e   : > { %2805 = vmatpush.bf16.msra.mxu0 %v3970_v18  ;;  %2818 = vmatpush.bf16.msra.mxu1 %v3978_v19 }
 0x79f   : > { %v1599_v56 = vmax.f32 %v1569_v48, 0.0  ;;  %v1600_v57 = vmax.f32 %v1582_v58, 0.0 }
 0x7a0   : > { %2830 = vmatpush.bf16.msrb.mxu3 %v3987_v21  ;;  %2843 = vmatpush.bf16.msrb.mxu2 %v3995_v22 }
 0x7a1   : > { %v1615_v12 = vpack.c.bf16 %v1599_v56, %v1599_v56  ;;  %v1616_v59 = vpack.c.bf16 %v1600_v57, %v1600_v57 }
 0x7a2   : > { %2806 = vmatpush.bf16.msra.mxu0 %v3969_v23  ;;  %2819 = vmatpush.bf16.msra.mxu1 %v3977_v25 }
 0x7a4   : > { %2831 = vmatpush.bf16.msrb.mxu3 %v3986_v32  ;;  %2844 = vmatpush.bf16.msrb.mxu2 %v3994_v33  ;;  %v1570_v45 = vpop.f32.mrf.mxu3  ;;  %v1583_v46 = vpop.f32.mrf.mxu2 }
 0x7a6   : > { %2807 = vmatpush.bf16.msra.mxu0 %v3968_v34  ;;  %2820 = vmatpush.bf16.msra.mxu1 %v3976_v35 }
 0x7a8   : > { %2832 = vmatpush.bf16.msrb.mxu3 %v3985_v38  ;;  %2845 = vmatpush.bf16.msrb.mxu2 %v3993_v39 }
 0x7aa   : > { %2808 = vmatpush.bf16.msra.mxu0 %v3967_v53  ;;  %2821 = vmatpush.bf16.msra.mxu1 %v3975_v42 }
 0x7ac   : > { %2833 = vmatpush.bf16.msrb.mxu3 %v3984_v24  ;;  %2846 = vmatpush.bf16.msrb.mxu2 %v3992_v47 }
 0x7ad   : > { %2809 = vmatmul.bf16.vlgmr.msra.gmra.mxu0 %v1613_v50  ;;  %2822 = vmatmul.bf16.vlgmr.msra.gmra.mxu1 %v1614_v51 }
 0x7b0   : > { %2834 = vmatpush.bf16.msrb.mxu3 %v3983_v20  ;;  %2847 = vmatpush.bf16.msrb.mxu2 %v3991_v54 }
 0x7b3   : > { %2835 = vmatmul.bf16.vlgmr.msrb.gmra.mxu3 %v1615_v12  ;;  %2848 = vmatmul.bf16.vlgmr.msrb.gmra.mxu2 %v1616_v59 }
 0x7e9   : > { %v2654_v60 = vpop.f32.mrf.mxu0  ;;  %v2667_v61 = vpop.f32.mrf.mxu1 }
 0x7ea   : > { %v2655_v8 = vadd.f32 %v4018_v52, %v2654_v60 }
 0x7ec   : > { %v2668_v11 = vadd.f32 %v2667_v61, %v2655_v8 }
 0x7f1   : > { %v2656_v62 = vpop.f32.mrf.mxu0  ;;  %v2669_v63 = vpop.f32.mrf.mxu1 }
 0x7f2   : > { %v4019_v62 = vld [vmem:[%s5152_s11] ss:$0 sm:$0xff] }
 0x7f6   : > { %v2680_v0 = vpop.f32.mrf.mxu3  ;;  %v2693_v1 = vpop.f32.mrf.mxu2 }
 0x7f7   : > { %v2681_v15 = vadd.f32 %v2680_v0, %v2668_v11 }
 0x7f9   : > { %v2694_v18 = vadd.f32 %v2693_v1, %v2681_v15 }
 0x7fa   : > { %v2706_v2 = vpop.f32.mrf.mxu0  ;;  %v2719_v3 = vpop.f32.mrf.mxu1 }
 0x7fb   : > { %v2707_v22 = vadd.f32 %v2706_v2, %v2694_v18 }
 0x7fd   : > { %v2720_v26 = vadd.f32 %v2719_v3, %v2707_v22 }
 0x7fe   : > { %v2682_v4 = vpop.f32.mrf.mxu3  ;;  %v2695_v5 = vpop.f32.mrf.mxu2 }
 0x802   : > { %v2708_v6 = vpop.f32.mrf.mxu0  ;;  %v2721_v7 = vpop.f32.mrf.mxu1 }
 0x806   : > { %v2732_v9 = vpop.f32.mrf.mxu3  ;;  %v2745_v10 = vpop.f32.mrf.mxu2 }
 0x807   : > { %v2733_v27 = vadd.f32 %v2732_v9, %v2720_v26 }
 0x809   : > { %v2746_v28 = vadd.f32 %v2745_v10, %v2733_v27 }
 0x80a   : > { %v2758_v13 = vpop.f32.mrf.mxu0  ;;  %v2771_v14 = vpop.f32.mrf.mxu1 }
 0x80b   : > { %v2759_v31 = vadd.f32 %v2758_v13, %v2746_v28 }
 0x80d   : > { %v2772_v32 = vadd.f32 %v2771_v14, %v2759_v31 }
 0x80e   : > { %v2734_v16 = vpop.f32.mrf.mxu3  ;;  %v2747_v17 = vpop.f32.mrf.mxu2 }
 0x812   : > { %v2760_v19 = vpop.f32.mrf.mxu0  ;;  %v2773_v21 = vpop.f32.mrf.mxu1 }
 0x816   : > { %v2784_v23 = vpop.f32.mrf.mxu3  ;;  %v2797_v25 = vpop.f32.mrf.mxu2 }
 0x817   : > { %v2785_v35 = vadd.f32 %v2784_v23, %v2772_v32 }
 0x819   : > { %v2798_v36 = vadd.f32 %v2797_v25, %v2785_v35 }
 0x81e   : > { %v2786_v29 = vpop.f32.mrf.mxu3  ;;  %v2799_v30 = vpop.f32.mrf.mxu2 }
 0x82a   : > { %v2810_v33 = vpop.f32.mrf.mxu0  ;;  %v2823_v34 = vpop.f32.mrf.mxu1 }
 0x82b   : > { %v2811_v37 = vadd.f32 %v2810_v33, %v2798_v36 }
 0x82d   : > { %v2824_v40 = vadd.f32 %v2823_v34, %v2811_v37 }
 0x832   : > { %v2812_v38 = vpop.f32.mrf.mxu0  ;;  %v2825_v39 = vpop.f32.mrf.mxu1 }
 0x836   : > { %v2836_v41 = vpop.f32.mrf.mxu3  ;;  %v2849_v53 = vpop.f32.mrf.mxu2 }
 0x837   : > { %v2837_v42 = vadd.f32 %v2836_v41, %v2824_v40 }
 0x839   : > { %v2850_v43 = vadd.f32 %v2849_v53, %v2837_v42 }
 0x83b   : > { %v2853_v44 = vadd.f32 %v2850_v43, %v4493_v49 }
 0x83d   : > { %v2856_v45 = vsel %vm493_vm0, %v2853_v44, 0.0 }
 0x83e   : > { %v2838_v46 = vpop.f32.mrf.mxu3  ;;  %v2851_v24 = vpop.f32.mrf.mxu2  ;;  %2857 = vadd.xlane.f32.xlu2 %v2856_v45 }
 0x8b1   : > { %v2858_v47 = vpop.xlane.xlu2 %2857 }
 0x8b2   : > { %v2859_v48 = vmul.f32 %v2858_v47, %v4270_v55 }
 0x8b4   : > { %v2860_v58 = vsub.f32 %v2853_v44, %v2859_v48 }
 0x8b6   : > { %v2861_v50 = vmul.f32 %v2860_v58, %v2860_v58 }
 0x8b8   : > { %v2862_v51 = vsel %vm493_vm0, %v2861_v50, 0.0 }
 0x8b9   : > { %2863 = vadd.xlane.f32.xlu1 %v2862_v51 }
 0x92c   : > { %v2864_v20 = vpop.xlane.xlu1 %2863 }
 0x92d   : > { %v2865_v54 = vmul.f32 %v2864_v20, %v4270_v55  ;;  %v4020_v55 = vld [vmem:[%s5153_s12] ss:$0 sm:$0xff] }
 0x92f   : > { %v2866_v56 = vadd.f32 1e-05, %v2865_v54 }
 0x931   : > { %4041 = vrsqrt.f32 %v2866_v56  ;;  %vm2873_vm10 = vweird.f32 %v2866_v56 }
 0x937   : > { %v4042_v49 = vpop.eup %4041 }
 0x938   : > { %v2868_v57 = vmul.f32 %v4042_v49, %v2866_v56  ;;  %vm2874_vm9 = vweird.f32 %v4042_v49 }
 0x939   : > { %vm2875_vm11 = vmor %vm2873_vm10, %vm2874_vm9 }
 0x93a   : > { %v2869_v12 = vmul.f32 %v4042_v49, %v2868_v57 }
 0x93c   : > { %v2870_v59 = vmul.f32 0.5, %v2869_v12 }
 0x93e   : > { %v2871_v60 = vsub.f32 1.5, %v2870_v59 }
 0x940   : > { %v2872_v61 = vmul.f32 %v4042_v49, %v2871_v60 }
 0x942   : > { %v2876_v63 = vsel %vm2875_vm11, %v4042_v49, %v2872_v61 }
 0x943   : > { %v2877_v0 = vmul.f32 %v2876_v63, %v2860_v58 }
 0x945   : > { %v2881_v1 = vmul.f32 %v4019_v62, %v2877_v0 }
 0x947   : > { %v2885_v2 = vadd.f32 %v4020_v55, %v2881_v1 }
 0x949   : > { %2886 = vst.msk [vmem:[%s435_s19] sm:$0xff] %vm493_vm0, %v2885_v2 }
 0x94a PF: > { %s23_s25 = sadd.s32 1, %s4049_s25  }
 0x94b   : > { %p20_p4 = scmp.ge.s32.totalorder %s23_s25, 4  }
 0x94d   :  { %22 = sbr.rel (!%p20_p4) target bundleno = 1 (0x1), region = 102 }

</bundles_post_ra>
